<compile_context>
chip_gen: v7x
topology: tpu7x:2x2x1
jax: 0.10.0
libtpu: 0.0.40
codegen_flags: <defaults>
</compile_context>

<pallas_src>
import jax
import jax.numpy as jnp
from jax import lax
from jax.experimental import pallas as pl
from jax.experimental.pallas import tpu as pltpu

# Small-shape analogue of the original (original: E=512, 2E=1024, OUT=300).
EMB_DIM = 64
OUT_DIM = 32
MAX_NEIGHBOURS = (4, 6, 8, 5)   # rootpath, children, obj_neighbours, dtype_neighbours
N_GROUPS = 4
N_MAX = max(MAX_NEIGHBOURS)     # padded neighbour slots per group
N_TOT = N_GROUPS * N_MAX        # 32
VOCAB = 50
BATCH = 4
TILE_B = 2                      # batch elements per grid step (both branches together)


def _round_up(x, m):
    return (x + m - 1) // m * m


NODE_ROWS = _round_up(2 * TILE_B, 8)            # node-index rows per tile (sublane aligned)
ROWS_PER_TILE = NODE_ROWS + 2 * TILE_B * N_TOT  # fused gather rows per tile


# ---------------------------------------------------------------------------
# Fused kernel: gather + 4x attend + context mix + Linear + cosine (per tile)
# ---------------------------------------------------------------------------
def fused_kernel(idx_ref,       # VMEM (ROWS_PER_TILE, 1) int32 : node + neighbour ids
                 emb_ref,       # VMEM (V, E)                   : embedding table
                 wv_ref,        # VMEM (G, N_MAX)               : w_g-folded v vectors (0 in pads)
                 pad_pen_ref,   # VMEM (1, N_TOT)               : 0 / -1e30 padding penalty
                 wn_ref,        # VMEM (E, OUT)                 : Linear weight, node half
                 wc_ref,        # VMEM (E, OUT)                 : Linear weight, context half
                 b_ref,         # VMEM (1, OUT)                 : Linear bias
                 out_ref):      # VMEM (1, TILE_B, 1)           : cosine similarity
    V, E = emb_ref.shape
    G, NMAX = wv_ref.shape
    NTOT = G * NMAX
    TB = out_ref.shape[1]
    BB = 2 * TB
    rows = idx_ref.shape[0]
    node_rows = rows - BB * NTOT

    # ---- single fused one-hot gather on the MXU (bit-exact in f32) --------
    cols = lax.broadcasted_iota(jnp.int32, (rows, V), 1)
    onehot = (idx_ref[...] == cols).astype(jnp.float32)             # (rows, V)
    gathered = jnp.dot(onehot, emb_ref[...],
                       preferred_element_type=jnp.float32)          # (rows, E)
    node = gathered[0:BB, :]                                        # (BB, E)
    neigh = gathered[node_rows:node_rows + BB * NTOT, :].reshape(BB, NTOT, E)

    # ---- attention scores for all 4 groups at once (batched MXU matmul) ---
    scores = jnp.einsum('bqe,bne->bqn', node[:, None, :], neigh,
                        preferred_element_type=jnp.float32)[:, 0, :]  # (BB, NTOT)

    # masked_softmax: raw score exactly 0 -> add -9999 (torch semantics);
    # padded slots -> -1e30 so they contribute exactly 0 to num & denom.
    s = scores + jnp.where(scores != 0.0, 0.0, -9999.0) + pad_pen_ref[...]

    sg = s.reshape(BB, G, NMAX)                                     # per-group softmax
    m = jnp.max(sg, axis=-1, keepdims=True)
    p = jnp.exp(sg - m)
    att = p / jnp.sum(p, axis=-1, keepdims=True)                    # exact reciprocal

    # group mixing weights already folded into wv (zeros in padded slots)
    weighted = (att * wv_ref[...][None, :, :]).reshape(BB, NTOT)    # (BB, NTOT)

    # ---- context = attention-weighted neighbour sum (batched MXU matmul) --
    context = jnp.einsum('bqn,bne->bqe', weighted[:, None, :], neigh,
                         preferred_element_type=jnp.float32)[:, 0, :]  # (BB, E)

    # ---- Linear(2E -> OUT) on concat([node, context]) in split-W form -----
    y = (jnp.dot(node, wn_ref[...], preferred_element_type=jnp.float32)
         + jnp.dot(context, wc_ref[...], preferred_element_type=jnp.float32)
         + b_ref[...])                                              # (BB, OUT)

    # ---- cosine similarity between the two branches ------------------------
    a = y[0:TB, :]
    c = y[TB:BB, :]
    eps = 1e-8
    dot = jnp.sum(a * c, axis=-1, keepdims=True)
    na2 = jnp.sum(a * a, axis=-1, keepdims=True)
    nc2 = jnp.sum(c * c, axis=-1, keepdims=True)
    cos = dot / jnp.maximum(jnp.sqrt(na2 * nc2), eps)               # (TB, 1)
    out_ref[...] = cos.reshape(1, TB, 1)


# ---------------------------------------------------------------------------
# Parameter-only preprocessing — hoisted, run ONCE (not per forward)
# ---------------------------------------------------------------------------
def prepare_params(params):
    E = params["emb"].shape[1]
    w_rp = params["w_scalars"][0]
    w_ch = params["w_scalars"][1]
    w_ob = params["w_scalars"][2]
    w_dt = 1.0 - (w_ob + w_ch + w_rp)

    def padv(v):  # (n,) -> (N_MAX,)
        return jnp.pad(v, (0, N_MAX - v.shape[-1]))

    wv = jnp.stack([w_rp * padv(params["v_rootpath"][0]),
                    w_ch * padv(params["v_children"][0]),
                    w_ob * padv(params["v_obj"][0]),
                    w_dt * padv(params["v_dtype"][0])], axis=0).astype(jnp.float32)

    lane = jnp.arange(N_TOT)
    limits = jnp.array(MAX_NEIGHBOURS, jnp.int32)[lane // N_MAX]
    pad_pen = jnp.where((lane % N_MAX) < limits, 0.0, -1e30)
    pad_pen = pad_pen.astype(jnp.float32).reshape(1, N_TOT)

    return {
        "emb": params["emb"].astype(jnp.float32),
        "wv": wv,
        "pad_pen": pad_pen,
        "W_node": params["W_out"][:E, :].astype(jnp.float32),
        "W_ctx": params["W_out"][E:, :].astype(jnp.float32),
        "b": params["b_out"].astype(jnp.float32),
    }


# ---------------------------------------------------------------------------
# Forward wrapper: only data-dependent index packing remains here
# ---------------------------------------------------------------------------
def siamese_forward(kparams, elements, rootpaths, children, obj_neighbours,
                    dtype_neighbours):
    B = elements.shape[1]
    nt = B // TILE_B

    def pad_group(x):  # (2, B, n) -> (2, B, N_MAX), pad with index 0
        return jnp.pad(x, ((0, 0), (0, 0), (0, N_MAX - x.shape[-1])))

    neigh_idx = jnp.stack([pad_group(rootpaths), pad_group(children),
                           pad_group(obj_neighbours), pad_group(dtype_neighbours)],
                          axis=2)                                   # (2, B, G, N_MAX)

    # tile-major row layout: tile t holds [branch0 batches, branch1 batches]
    node_tiles = (elements[:, :, 0].reshape(2, nt, TILE_B)
                  .transpose(1, 0, 2).reshape(nt, 2 * TILE_B))
    node_tiles = jnp.pad(node_tiles, ((0, 0), (0, NODE_ROWS - 2 * TILE_B)))
    neigh_tiles = (neigh_idx.reshape(2, nt, TILE_B, N_GROUPS, N_MAX)
                   .transpose(1, 0, 2, 3, 4).reshape(nt, 2 * TILE_B * N_TOT))
    all_idx = jnp.concatenate([node_tiles, neigh_tiles], axis=1)
    all_idx = all_idx.reshape(nt * ROWS_PER_TILE, 1).astype(jnp.int32)

    V, E = kparams["emb"].shape
    OUT = kparams["b"].shape[1]

    out = pl.pallas_call(
        fused_kernel,
        out_shape=jax.ShapeDtypeStruct((nt, TILE_B, 1), jnp.float32),
        grid=(nt,),
        in_specs=[
            pl.BlockSpec((ROWS_PER_TILE, 1), lambda t: (t, 0)),     # fused indices
            pl.BlockSpec((V, E), lambda t: (0, 0)),                 # embedding table
            pl.BlockSpec((N_GROUPS, N_MAX), lambda t: (0, 0)),      # folded v vectors
            pl.BlockSpec((1, N_TOT), lambda t: (0, 0)),             # pad penalty
            pl.BlockSpec((E, OUT), lambda t: (0, 0)),               # W_node
            pl.BlockSpec((E, OUT), lambda t: (0, 0)),               # W_ctx
            pl.BlockSpec((1, OUT), lambda t: (0, 0)),               # bias
        ],
        out_specs=pl.BlockSpec((1, TILE_B, 1), lambda t: (t, 0, 0)),
        compiler_params=pltpu.CompilerParams(
            dimension_semantics=("parallel",),
            vmem_limit_bytes=64 * 1024 * 1024),
    )(all_idx, kparams["emb"], kparams["wv"], kparams["pad_pen"],
      kparams["W_node"], kparams["W_ctx"], kparams["b"])
    return out.reshape(B)


# ---------------------------------------------------------------------------
# Pure-JAX reference (mirrors the torch forward) for a sanity check
# ---------------------------------------------------------------------------
def reference(params, elements, rootpaths, children, obj_neighbours,
              dtype_neighbours):
    emb = params["emb"]

    def attend(node, idx, v):
        neigh = emb[idx]
        scores = jnp.einsum('bne,be->bn', neigh, node)
        mask = jnp.where(scores != 0.0, 0.0, -9999.0)
        att = jax.nn.softmax(scores + mask, axis=-1)
        return jnp.einsum('n,bn,bne->be', v, att, neigh)

    outs = []
    w_rp, w_ch, w_ob = (params["w_scalars"][0], params["w_scalars"][1],
                        params["w_scalars"][2])
    for i in range(2):
        node = emb[elements[i, :, 0]]
        c_rp = attend(node, rootpaths[i], params["v_rootpath"][0])
        c_ch = attend(node, children[i], params["v_children"][0])
        c_ob = attend(node, obj_neighbours[i], params["v_obj"][0])
        c_dt = attend(node, dtype_neighbours[i], params["v_dtype"][0])
        ctx = (w_rp * c_rp + w_ch * c_ch + w_ob * c_ob
               + (1.0 - (w_ob + w_ch + w_rp)) * c_dt)
        x = jnp.concatenate([node, ctx], axis=1)
        outs.append(x @ params["W_out"] + params["b_out"][0])
    a, b = outs
    eps = 1e-8
    dot = jnp.sum(a * b, axis=-1)
    na = jnp.sqrt(jnp.sum(a * a, axis=-1))
    nb = jnp.sqrt(jnp.sum(b * b, axis=-1))
    return dot / jnp.maximum(na * nb, eps)        # torch CosineSimilarity semantics


# ---------------------------------------------------------------------------
if __name__ == "__main__":
    key = jax.random.PRNGKey(0)
    k_emb, k_w, k_W, k_b, k_el, k_rp, k_ch, k_ob, k_dt = jax.random.split(key, 9)

    # Parameters (deterministic, synthetic)
    emb_vals = jax.random.normal(k_emb, (VOCAB, EMB_DIM), dtype=jnp.float32)
    emb_vals = emb_vals.at[0].set(0.0)          # index 0 = zero/padding embedding
    N0, N1, N2, N3 = MAX_NEIGHBOURS
    params = {
        "emb": emb_vals,
        "v_rootpath": jnp.full((1, N0), 1.0 / N0, jnp.float32),
        "v_children": jnp.full((1, N1), 1.0 / N1, jnp.float32),
        "v_obj": jnp.full((1, N2), 1.0 / N2, jnp.float32),
        "v_dtype": jnp.full((1, N3), 1.0 / N3, jnp.float32),
        "w_scalars": jax.random.normal(k_w, (3,), dtype=jnp.float32),
        "W_out": 0.05 * jax.random.normal(k_W, (2 * EMB_DIM, OUT_DIM), jnp.float32),
        "b_out": 0.05 * jax.random.normal(k_b, (1, OUT_DIM), jnp.float32),
    }

    # Inputs: index tensors for both siamese branches
    elements = jax.random.randint(k_el, (2, BATCH, 1), 1, VOCAB, dtype=jnp.int32)
    rootpaths = jax.random.randint(k_rp, (2, BATCH, N0), 0, VOCAB, dtype=jnp.int32)
    children = jax.random.randint(k_ch, (2, BATCH, N1), 0, VOCAB, dtype=jnp.int32)
    obj_neighbours = jax.random.randint(k_ob, (2, BATCH, N2), 0, VOCAB, dtype=jnp.int32)
    dtype_neighbours = jax.random.randint(k_dt, (2, BATCH, N3), 0, VOCAB, dtype=jnp.int32)
    # ensure some zero-embedding neighbours exercise the masked-softmax path
    children = children.at[:, :, -1].set(0)
    dtype_neighbours = dtype_neighbours.at[:, :, -2:].set(0)

    # one-time parameter preprocessing (hoisted out of the forward)
    kparams = prepare_params(params)
    kparams = jax.tree_util.tree_map(jax.block_until_ready, kparams)

    forward = jax.jit(siamese_forward)
    out = forward(kparams, elements, rootpaths, children,
                  obj_neighbours, dtype_neighbours)
    out = jax.block_until_ready(out)

    ref = reference(params, elements, rootpaths, children,
                    obj_neighbours, dtype_neighbours)
    assert out.shape == (BATCH,)
    # tolerance covers f32 (vs torch f64) softmax and MXU accumulation order
    assert jnp.allclose(out, ref, atol=1e-3, rtol=1e-3), (out, ref)

    print("KERNEL_OK")
</pallas_src>

<mosaic_0001>
module attributes {stable_mosaic.version = 11 : i64} {
  func.func @fused_kernel(%arg0: i32, %arg1: memref<136x1xi32, #tpu.memory_space<vmem>>, %arg2: memref<50x64xf32, #tpu.memory_space<vmem>>, %arg3: memref<4x8xf32, #tpu.memory_space<vmem>>, %arg4: memref<1x32xf32, #tpu.memory_space<vmem>>, %arg5: memref<64x32xf32, #tpu.memory_space<vmem>>, %arg6: memref<64x32xf32, #tpu.memory_space<vmem>>, %arg7: memref<1x32xf32, #tpu.memory_space<vmem>>, %arg8: memref<1x2x1xf32, #tpu.memory_space<vmem>>) attributes {dimension_semantics = [#tpu.dimension_semantics<parallel>], iteration_bounds = array<i64: 2>, scalar_prefetch = 0 : i64, scratch_operands = 0 : i64, tpu.core_type = #tpu.core_type<tc>, window_params = [{transform_indices = @transform_0, window_bounds = array<i64: 136, 1>}, {pipeline_mode = #tpu.pipeline_mode<synchronous>, transform_indices = @transform_1, window_bounds = array<i64: 50, 64>}, {pipeline_mode = #tpu.pipeline_mode<synchronous>, transform_indices = @transform_2, window_bounds = array<i64: 4, 8>}, {pipeline_mode = #tpu.pipeline_mode<synchronous>, transform_indices = @transform_3, window_bounds = array<i64: 1, 32>}, {pipeline_mode = #tpu.pipeline_mode<synchronous>, transform_indices = @transform_4, window_bounds = array<i64: 64, 32>}, {pipeline_mode = #tpu.pipeline_mode<synchronous>, transform_indices = @transform_5, window_bounds = array<i64: 64, 32>}, {pipeline_mode = #tpu.pipeline_mode<synchronous>, transform_indices = @transform_6, window_bounds = array<i64: 1, 32>}, {transform_indices = @transform_7, window_bounds = array<i64: 1, 2, 1>}]} {
    %0 = tpu.iota {dimensions = array<i32: 1>} : vector<136x50xi32>
    %c0 = arith.constant 0 : index
    %c0_0 = arith.constant 0 : index
    %1 = vector.load %arg1[%c0, %c0_0] : memref<136x1xi32, #tpu.memory_space<vmem>>, vector<136x1xi32>
    %2 = vector.broadcast %1 : vector<136x1xi32> to vector<136x50xi32>
    %3 = arith.cmpi eq, %2, %0 : vector<136x50xi32>
    %4 = arith.extui %3 : vector<136x50xi1> to vector<136x50xi32>
    %5 = arith.sitofp %4 : vector<136x50xi32> to vector<136x50xf32>
    %c0_1 = arith.constant 0 : index
    %c0_2 = arith.constant 0 : index
    %6 = vector.load %arg2[%c0_1, %c0_2] : memref<50x64xf32, #tpu.memory_space<vmem>>, vector<50x64xf32>
    %cst = arith.constant dense<0.000000e+00> : vector<136x64xf32>
    %7 = tpu.matmul %5, %6, %cst {dimension_numbers = #tpu.dot_dimension_numbers<[1], [0], [0], [1], [0, 0, 1, 1], [], []>} : vector<136x50xf32>, vector<50x64xf32>, vector<136x64xf32> -> vector<136x64xf32>
    %8 = vector.extract_strided_slice %7 {offsets = [0, 0], sizes = [4, 64], strides = [1, 1]} : vector<136x64xf32> to vector<4x64xf32>
    %9 = vector.extract_strided_slice %7 {offsets = [8, 0], sizes = [128, 64], strides = [1, 1]} : vector<136x64xf32> to vector<128x64xf32>
    %10 = vector.shape_cast %9 : vector<128x64xf32> to vector<4x32x64xf32>
    %11 = vector.shape_cast %8 : vector<4x64xf32> to vector<4x1x64xf32>
    "tpu.trace_start"() <{level = 10 : i32, message = "bqe,bne->bqn"}> : () -> ()
    %cst_3 = arith.constant dense<0.000000e+00> : vector<4x1x32xf32>
    %12 = tpu.matmul %11, %10, %cst_3 {dimension_numbers = #tpu.dot_dimension_numbers<[2], [2], [1], [1], [0, 0, 0, 1, 1, 1], [0], [0]>} : vector<4x1x64xf32>, vector<4x32x64xf32>, vector<4x1x32xf32> -> vector<4x1x32xf32>
    "tpu.trace_stop"() : () -> ()
    %13 = vector.shape_cast %12 : vector<4x1x32xf32> to vector<4x32xf32>
    %cst_4 = arith.constant 0.000000e+00 : f32
    %14 = vector.broadcast %cst_4 : f32 to vector<4x32xf32>
    %15 = arith.cmpf one, %13, %14 : vector<4x32xf32>
    %cst_5 = arith.constant 0.000000e+00 : f32
    %cst_6 = arith.constant -9.999000e+03 : f32
    %16 = vector.broadcast %cst_5 : f32 to vector<4x32xf32>
    %17 = vector.broadcast %cst_6 : f32 to vector<4x32xf32>
    %18 = arith.select %15, %16, %17 : vector<4x32xi1>, vector<4x32xf32>
    %19 = arith.addf %13, %18 : vector<4x32xf32>
    %c0_7 = arith.constant 0 : index
    %c0_8 = arith.constant 0 : index
    %20 = vector.load %arg4[%c0_7, %c0_8] : memref<1x32xf32, #tpu.memory_space<vmem>>, vector<1x32xf32>
    %21 = vector.broadcast %20 : vector<1x32xf32> to vector<4x32xf32>
    %22 = arith.addf %19, %21 : vector<4x32xf32>
    %23 = vector.shape_cast %22 : vector<4x32xf32> to vector<4x4x8xf32>
    %cst_9 = arith.constant dense<0xFF800000> : vector<4x4xf32>
    %24 = vector.multi_reduction <maximumf>, %23, %cst_9 [2] : vector<4x4x8xf32> to vector<4x4xf32>
    %25 = vector.shape_cast %24 : vector<4x4xf32> to vector<4x4x1xf32>
    %26 = vector.broadcast %25 : vector<4x4x1xf32> to vector<4x4x8xf32>
    %27 = arith.subf %23, %26 : vector<4x4x8xf32>
    %28 = math.exp %27 : vector<4x4x8xf32>
    %cst_10 = arith.constant dense<0.000000e+00> : vector<4x4xf32>
    %29 = vector.multi_reduction <add>, %28, %cst_10 [2] : vector<4x4x8xf32> to vector<4x4xf32>
    %30 = vector.shape_cast %29 : vector<4x4xf32> to vector<4x4x1xf32>
    %31 = vector.broadcast %30 : vector<4x4x1xf32> to vector<4x4x8xf32>
    %32 = arith.divf %28, %31 : vector<4x4x8xf32>
    %c0_11 = arith.constant 0 : index
    %c0_12 = arith.constant 0 : index
    %33 = vector.load %arg3[%c0_11, %c0_12] : memref<4x8xf32, #tpu.memory_space<vmem>>, vector<4x8xf32>
    %34 = vector.shape_cast %33 : vector<4x8xf32> to vector<1x4x8xf32>
    %35 = vector.broadcast %34 : vector<1x4x8xf32> to vector<4x4x8xf32>
    %36 = arith.mulf %32, %35 : vector<4x4x8xf32>
    %37 = vector.shape_cast %36 : vector<4x4x8xf32> to vector<4x32xf32>
    %38 = vector.shape_cast %37 : vector<4x32xf32> to vector<4x1x32xf32>
    "tpu.trace_start"() <{level = 10 : i32, message = "bqn,bne->bqe"}> : () -> ()
    %cst_13 = arith.constant dense<0.000000e+00> : vector<4x1x64xf32>
    %39 = tpu.matmul %38, %10, %cst_13 {dimension_numbers = #tpu.dot_dimension_numbers<[2], [1], [1], [2], [0, 0, 0, 1, 1, 2], [0], [0]>} : vector<4x1x32xf32>, vector<4x32x64xf32>, vector<4x1x64xf32> -> vector<4x1x64xf32>
    "tpu.trace_stop"() : () -> ()
    %40 = vector.shape_cast %39 : vector<4x1x64xf32> to vector<4x64xf32>
    %c0_14 = arith.constant 0 : index
    %c0_15 = arith.constant 0 : index
    %41 = vector.load %arg5[%c0_14, %c0_15] : memref<64x32xf32, #tpu.memory_space<vmem>>, vector<64x32xf32>
    %cst_16 = arith.constant dense<0.000000e+00> : vector<4x32xf32>
    %42 = tpu.matmul %8, %41, %cst_16 {dimension_numbers = #tpu.dot_dimension_numbers<[1], [0], [0], [1], [0, 0, 1, 1], [], []>} : vector<4x64xf32>, vector<64x32xf32>, vector<4x32xf32> -> vector<4x32xf32>
    %c0_17 = arith.constant 0 : index
    %c0_18 = arith.constant 0 : index
    %43 = vector.load %arg6[%c0_17, %c0_18] : memref<64x32xf32, #tpu.memory_space<vmem>>, vector<64x32xf32>
    %cst_19 = arith.constant dense<0.000000e+00> : vector<4x32xf32>
    %44 = tpu.matmul %40, %43, %cst_19 {dimension_numbers = #tpu.dot_dimension_numbers<[1], [0], [0], [1], [0, 0, 1, 1], [], []>} : vector<4x64xf32>, vector<64x32xf32>, vector<4x32xf32> -> vector<4x32xf32>
    %45 = arith.addf %42, %44 : vector<4x32xf32>
    %c0_20 = arith.constant 0 : index
    %c0_21 = arith.constant 0 : index
    %46 = vector.load %arg7[%c0_20, %c0_21] : memref<1x32xf32, #tpu.memory_space<vmem>>, vector<1x32xf32>
    %47 = vector.broadcast %46 : vector<1x32xf32> to vector<4x32xf32>
    %48 = arith.addf %45, %47 : vector<4x32xf32>
    %49 = vector.extract_strided_slice %48 {offsets = [0, 0], sizes = [2, 32], strides = [1, 1]} : vector<4x32xf32> to vector<2x32xf32>
    %50 = vector.extract_strided_slice %48 {offsets = [2, 0], sizes = [2, 32], strides = [1, 1]} : vector<4x32xf32> to vector<2x32xf32>
    %51 = arith.mulf %49, %50 : vector<2x32xf32>
    %cst_22 = arith.constant dense<0.000000e+00> : vector<2xf32>
    %52 = vector.multi_reduction <add>, %51, %cst_22 [1] : vector<2x32xf32> to vector<2xf32>
    %53 = vector.shape_cast %52 : vector<2xf32> to vector<2x1xf32>
    %54 = arith.mulf %49, %49 : vector<2x32xf32>
    %cst_23 = arith.constant dense<0.000000e+00> : vector<2xf32>
    %55 = vector.multi_reduction <add>, %54, %cst_23 [1] : vector<2x32xf32> to vector<2xf32>
    %56 = vector.shape_cast %55 : vector<2xf32> to vector<2x1xf32>
    %57 = arith.mulf %50, %50 : vector<2x32xf32>
    %cst_24 = arith.constant dense<0.000000e+00> : vector<2xf32>
    %58 = vector.multi_reduction <add>, %57, %cst_24 [1] : vector<2x32xf32> to vector<2xf32>
    %59 = vector.shape_cast %58 : vector<2xf32> to vector<2x1xf32>
    %60 = arith.mulf %56, %59 : vector<2x1xf32>
    %61 = math.sqrt %60 : vector<2x1xf32>
    %cst_25 = arith.constant 9.99999993E-9 : f32
    %62 = vector.broadcast %cst_25 : f32 to vector<2x1xf32>
    %63 = arith.maximumf %61, %62 : vector<2x1xf32>
    %64 = arith.divf %53, %63 : vector<2x1xf32>
    %65 = vector.shape_cast %64 : vector<2x1xf32> to vector<1x2x1xf32>
    %c0_26 = arith.constant 0 : index
    %c0_27 = arith.constant 0 : index
    %c0_28 = arith.constant 0 : index
    %66 = vector.load %arg8[%c0_26, %c0_27, %c0_28] : memref<1x2x1xf32, #tpu.memory_space<vmem>>, vector<1x2x1xf32>
    tpu.vector_store %arg8[%c0_26, %c0_27, %c0_28], %65 {strides = array<i32>} : memref<1x2x1xf32, #tpu.memory_space<vmem>>, vector<1x2x1xf32>,
    return
  }
  func.func @transform_0(%arg0: i32) -> (i32, i32) {
    %c0_i32 = arith.constant 0 : i32
    %c0_i32_0 = arith.constant 0 : i32
    return %arg0, %c0_i32 : i32, i32
  }
  func.func @transform_1(%arg0: i32) -> (i32, i32) {
    %c0_i32 = arith.constant 0 : i32
    %c0_i32_0 = arith.constant 0 : i32
    %c0_i32_1 = arith.constant 0 : i32
    return %c0_i32, %c0_i32_0 : i32, i32
  }
  func.func @transform_2(%arg0: i32) -> (i32, i32) {
    %c0_i32 = arith.constant 0 : i32
    %c0_i32_0 = arith.constant 0 : i32
    %c0_i32_1 = arith.constant 0 : i32
    return %c0_i32, %c0_i32_0 : i32, i32
  }
  func.func @transform_3(%arg0: i32) -> (i32, i32) {
    %c0_i32 = arith.constant 0 : i32
    %c0_i32_0 = arith.constant 0 : i32
    %c0_i32_1 = arith.constant 0 : i32
    return %c0_i32, %c0_i32_0 : i32, i32
  }
  func.func @transform_4(%arg0: i32) -> (i32, i32) {
    %c0_i32 = arith.constant 0 : i32
    %c0_i32_0 = arith.constant 0 : i32
    %c0_i32_1 = arith.constant 0 : i32
    return %c0_i32, %c0_i32_0 : i32, i32
  }
  func.func @transform_5(%arg0: i32) -> (i32, i32) {
    %c0_i32 = arith.constant 0 : i32
    %c0_i32_0 = arith.constant 0 : i32
    %c0_i32_1 = arith.constant 0 : i32
    return %c0_i32, %c0_i32_0 : i32, i32
  }
  func.func @transform_6(%arg0: i32) -> (i32, i32) {
    %c0_i32 = arith.constant 0 : i32
    %c0_i32_0 = arith.constant 0 : i32
    %c0_i32_1 = arith.constant 0 : i32
    return %c0_i32, %c0_i32_0 : i32, i32
  }
  func.func @transform_7(%arg0: i32) -> (i32, i32, i32) {
    %c0_i32 = arith.constant 0 : i32
    %c0_i32_0 = arith.constant 0 : i32
    %c0_i32_1 = arith.constant 0 : i32
    return %arg0, %c0_i32, %c0_i32_0 : i32, i32, i32
  }
}

</mosaic_0001>

<bundles_post_ra>
// kernel: squeeze.1
= control target key start
LH: loop header
LB: loop body
LE: loop exit
PB: predicated region body
PF: predicated region fallthrough
CT: control target
= control target key end

     0   :  { %vm7_vm0 = vcmask 15360   ;;  %s48_s0 = inlined_call_operand.vmem [shape: s32[2,4], index: 0, kind: input, shape index: {}]   ;;  %s49_s1 = inlined_call_operand.vmem [shape: s32[2,2,2], index: 1, kind: output, shape index: {}]  }
   0x1   :  { %v4_v0 = vld [vmem:[%s48_s0] sm:$0x3]  ;;  %s28_s0 = smov 126  }
   0x2   :  { %5 = vst [vmem:[#allocation1] sm:$0x3] %v4_v0 }
   0x9   :  { %v9_v1 = vld [vmem:[#allocation1] sm:$0x3]  }
   0xa   :  { %v6_v2 = vld [vmem:[#allocation1] sm:$0x3]   ;;  %10 = vrot.lane.b32.xlu0 %v9_v1, %s28_s0 }
   0xb   :  { %8 = vst.msk [vmem:[#allocation0] ss:$8 sm:$0x3] %vm7_vm0, %v6_v2  }
  0x7c   :  { %v11_v3 = vpop.permute.xlu0 %10  }
  0x7d   :  { %14 = vst.msk [vmem:[#allocation0 + $0x1] ss:$8 sm:$0x3] %vm7_vm0, %v11_v3  }
  0x84   :  { %v18_v4 = vld [vmem:[#allocation0] sm:$0x3]  ;;  %v22_v5 = vld [vmem:[#allocation0 + $0x8] sm:$0x3] }
  0x85   :  { %20 = vst [vmem:[%s49_s1] sm:$0x3] %v18_v4  ;;  %26 = vst [vmem:[%s49_s1 + $0x2] sm:$0x3] %v22_v5 }

// kernel: siamese_forward.1
= control target key start
LH: loop header
LB: loop body
LE: loop exit
PB: predicated region body
PF: predicated region fallthrough
CT: control target
= control target key end

     0   :  { %s3610_s0 = inlined_call_operand.hbm [shape: s32[272,1], index: 0, kind: input, shape index: {}]   ;;  %s3611_s1 = inlined_call_operand.hbm [shape: f32[50,64], index: 1, kind: input, shape index: {}]   ;;  %s3612_s2 = inlined_call_operand.hbm [shape: f32[4,8], index: 2, kind: input, shape index: {}]   ;;  %s3613_s3 = inlined_call_operand.hbm [shape: f32[1,32], index: 3, kind: input, shape index: {}]   ;;  %s3614_s4 = inlined_call_operand.hbm [shape: f32[64,32], index: 4, kind: input, shape index: {}]   ;;  %s3615_s5 = inlined_call_operand.hbm [shape: f32[64,32], index: 5, kind: input, shape index: {}]   ;;  %s3616_s6 = inlined_call_operand.hbm [shape: f32[1,32], index: 6, kind: input, shape index: {}]   ;;  %s3617_s7 = inlined_call_operand.hbm [shape: f32[2,2,1], index: 7, kind: output, shape index: {}]  }
   0x1   :  { %3623 = sst [smem:[#allocation20_spill]] %s3611_s1 }
   0x2   :  { %12 = vsyncpa [#allocation3], 0 }
   0x3   :  { %14 = vsyncpa [#allocation3 + $0x1], 0 }
   0x4   :  { %15 = vsyncpa [#allocation6], 0 }
   0x5   :  { %16 = vsyncpa [#allocation9], 0 }
   0x6   :  { %17 = vsyncpa [#allocation12], 0 }
   0x7   :  { %18 = vsyncpa [#allocation4], 0 }
   0x8   :  { %20 = vsyncpa [#allocation4 + $0x1], 0  ;;  %s2981_s24 = smov 0   ;;  %s2983_s25 = smov 0  }
   0x9   :  { %s2985_s26 = smov 0   ;;  %s2987_s27 = smov 0  }
   0xa LB: > { %s2917_s28 = smov [#allocation5]   ;;  %s3002_s30 = sadd.s32 4294967295, %s2915_s27   ;;  %s2915_s27 = sphi %s2987_s27, %s3650_s27   ;;  %s2911_s26 = sphi %s2985_s26, %s3649_s26   ;;  %s2907_s25 = sphi %s2983_s25, %s3648_s25   ;;  %s2903_s24 = sphi %s2981_s24, %s3647_s24  }
   0xb   : > { %s221_s29 = sshll.u32 %s2917_s28, 4  ;;  %p2045_p0 = scmp.ge.s32.totalorder %s2915_s27, 1  ;;  %s3007_s29 = int_to_ptr.vmem [resolvable:$true] %s221_s29 }
   0xc   : > { %p3618_p1 = scmp.eq.s32.totalorder %s3002_s30, 0  ;;  %p209_p2 = scmp.lt.s32.totalorder %s2915_s27, 3 }
   0xd   : > { %s2918_s9 = smov [#allocation8]   ;;  %s2919_s12 = smov [#allocation11]  }
   0xe   : > { %p3009_p3 = pnand %p2045_p0, %p209_p2  ;;  %s246_s10 = sshll.u32 %s2918_s9, 4  ;;  %s3022_s10 = int_to_ptr.vmem [resolvable:$true] %s246_s10 }
   0xf   : > { %s269_s13 = sshll.u32 %s2919_s12, 4  ;;  %s3626_s1 = sld [smem:[#allocation20_spill]]  ;;  %s3024_s13 = int_to_ptr.vmem [resolvable:$true] %s269_s13 }
  0x10   : > { %s3624_s8 = scalar_select %p3009_p3, 1, 0 }
  0x11   : > { %p2522_p5 = pneg %p3009_p3 }
  0x13   : > { %p3018_p6 = pnand %p2522_p5, %p3618_p1 }
  0x15   : > { %s2639_s16 = scalar_lea.hbm %s3626_s1, 896  ;;  %p3034_p8 = pneg %p3018_p6 }
  0x16   : > { %p2640_p7 = scmp.ne.s32.totalorder %s3626_s1, %s2639_s16  ;;  %p2646_p11 = scmp.lt.u32.totalorder %s2639_s16, %s3626_s1 }
  0x18   : > { %p2642_p9 = pnand %p3034_p8, %p2640_p7 }
  0x1a   : > { %p2643_p10 = pneg %p2642_p9 }
  0x1c   : > { %p2648_p12 = pnand %p2646_p11, %p2643_p10 }
  0x1e   : > { %2651 = shalt.err (!%p2648_p12)
}
  0x1f   : > { %s2652_s22 = scalar_lea.vmem %s3007_s29, 896  ;;  %p2660_p5 = scmp.lt.s32.totalorder %s3007_s29, %s3007_s29 }
  0x20   : > { %p2653_p13 = scmp.ne.s32.totalorder %s3007_s29, %s2652_s22  ;;  %p2661_p4 = scmp.lt.s32.totalorder %s2652_s22, %s2652_s22 }
  0x22   : > { %p2655_p0 = pnand %p2653_p13, %p3034_p8  ;;  %p2662_p7 = por %p2661_p4, %p2660_p5 }
  0x24   : > { %p2656_p2 = pneg %p2655_p0 }
  0x26   : > { %p2663_p9 = pnand %p2662_p7, %p2656_p2 }
  0x28   : > { %2666 = shalt.err (!%p2663_p9)
}
  0x29   : > { %s3620_s23 = smov 128   ;;  %s3621_s28 = smov 8  }
  0x2a   : > { %2525 = dma.hbm_to_vmem [thread:$0]  (!%p3018_p6), %s3626_s1, 896, %s3007_s29, [#allocation6], %s3620_s23, %s3620_s23, %s3621_s28  }
  0x2b   : > { %s2667_s16 = scalar_lea.hbm %s3613_s3, 16 }
  0x2c   : > { %p2668_p4 = scmp.ne.s32.totalorder %s3613_s3, %s2667_s16  ;;  %p2674_p12 = scmp.lt.u32.totalorder %s2667_s16, %s3613_s3 }
  0x2e   : > { %p2670_p10 = pnand %p2668_p4, %p3034_p8 }
  0x30   : > { %p2671_p11 = pneg %p2670_p10 }
  0x32   : > { %p2676_p13 = pnand %p2674_p12, %p2671_p11 }
  0x34   : > { %2679 = shalt.err (!%p2676_p13)
}
  0x35   : > { %s2680_s29 = scalar_lea.vmem %s3022_s10, 16  ;;  %s2687_s22 = scalar_lea.vmem %s3022_s10, 32 }
  0x36   : > { %p2681_p0 = scmp.ne.s32.totalorder %s3022_s10, %s2680_s29  ;;  %p2688_p7 = scmp.lt.s32.totalorder %s3022_s10, %s3022_s10 }
  0x37   : > { %p2689_p9 = scmp.lt.s32.totalorder %s2687_s22, %s2680_s29 }
  0x38   : > { %p2683_p2 = pnand %p2681_p0, %p3034_p8 }
  0x39   : > { %p2690_p4 = por %p2689_p9, %p2688_p7 }
  0x3a   : > { %p2684_p5 = pneg %p2683_p2 }
  0x3c   : > { %p2691_p10 = pnand %p2690_p4, %p2684_p5 }
  0x3e   : > { %2694 = shalt.err (!%p2691_p10)
}
  0x3f   : > { %2531 = dma.hbm_to_vmem [thread:$0]  (!%p3018_p6), %s3613_s3, 16, %s3022_s10, [#allocation9]  }
  0x40   : > { %s2695_s16 = scalar_lea.hbm %s3615_s5, 1024 }
  0x41   : > { %p2696_p11 = scmp.ne.s32.totalorder %s3615_s5, %s2695_s16  ;;  %p2702_p0 = scmp.lt.u32.totalorder %s2695_s16, %s3615_s5 }
  0x43   : > { %p2698_p12 = pnand %p2696_p11, %p3034_p8 }
  0x45   : > { %p2699_p13 = pneg %p2698_p12 }
  0x47   : > { %p2704_p2 = pnand %p2702_p0, %p2699_p13 }
  0x49   : > { %2707 = shalt.err (!%p2704_p2)
}
  0x4a   : > { %s2708_s10 = scalar_lea.vmem %s3024_s13, 1024  ;;  %p2716_p4 = scmp.lt.s32.totalorder %s3024_s13, %s3024_s13 }
  0x4b   : > { %p2709_p5 = scmp.ne.s32.totalorder %s3024_s13, %s2708_s10  ;;  %p2717_p10 = scmp.lt.s32.totalorder %s2708_s10, %s2708_s10 }
  0x4d   : > { %p2711_p7 = pnand %p2709_p5, %p3034_p8  ;;  %p2718_p11 = por %p2717_p10, %p2716_p4 }
  0x4f   : > { %p2712_p9 = pneg %p2711_p7 }
  0x51   : > { %p2719_p12 = pnand %p2718_p11, %p2712_p9 }
  0x53   : > { %2722 = shalt.err (!%p2719_p12)
}
  0x54   : > { %2537 = dma.hbm_to_vmem [thread:$0]  (!%p3018_p6), %s3615_s5, 1024, %s3024_s13, [#allocation12], %s3620_s23, %s3620_s23, %s3621_s28  }
  0x55   : > { %s2922_s9 = smov [#allocation7]   ;;  %s2923_s14 = smov [#allocation10]  }
  0x56   : > { %s235_s12 = sshll.u32 %s2922_s9, 4  ;;  %s256_s15 = sshll.u32 %s2923_s14, 4  ;;  %s236_s12 = int_to_ptr.vmem [resolvable:$true] %s235_s12  ;;  %s257_s15 = int_to_ptr.vmem [resolvable:$true] %s256_s15 }
  0x57   : > { %s2723_s18 = scalar_lea.hbm %s3612_s2, 64 }
  0x58   : > { %p2724_p13 = scmp.ne.s32.totalorder %s3612_s2, %s2723_s18  ;;  %p2730_p5 = scmp.lt.u32.totalorder %s2723_s18, %s3612_s2 }
  0x5a   : > { %p2726_p0 = pnand %p2724_p13, %p3034_p8 }
  0x5c   : > { %p2727_p2 = pneg %p2726_p0 }
  0x5e   : > { %p2732_p7 = pnand %p2730_p5, %p2727_p2 }
  0x60   : > { %2735 = shalt.err (!%p2732_p7)
}
  0x61   : > { %s2736_s13 = scalar_lea.vmem %s236_s12, 64  ;;  %p2744_p11 = scmp.lt.s32.totalorder %s236_s12, %s236_s12 }
  0x62   : > { %p2737_p9 = scmp.ne.s32.totalorder %s236_s12, %s2736_s13  ;;  %p2745_p12 = scmp.lt.s32.totalorder %s2736_s13, %s2736_s13 }
  0x64   : > { %p2739_p4 = pnand %p2737_p9, %p3034_p8  ;;  %p2746_p1 = por %p2745_p12, %p2744_p11 }
  0x66   : > { %p2740_p10 = pneg %p2739_p4 }
  0x68   : > { %p2747_p3 = pnand %p2746_p1, %p2740_p10 }
  0x6a   : > { %2750 = shalt.err (!%p2747_p3)
}
  0x6b   : > { %2528 = dma.hbm_to_vmem [thread:$0]  (!%p3018_p6), %s3612_s2, 64, %s236_s12, [#allocation6]  }
  0x6c   : > { %s2751_s17 = scalar_lea.hbm %s3614_s4, 1024 }
  0x6d   : > { %p2752_p13 = scmp.ne.s32.totalorder %s3614_s4, %s2751_s17  ;;  %p2758_p3 = scmp.lt.u32.totalorder %s2751_s17, %s3614_s4 }
  0x6f   : > { %p2754_p0 = pnand %p2752_p13, %p3034_p8 }
  0x71   : > { %p2755_p1 = pneg %p2754_p0 }
  0x73   : > { %p2760_p2 = pnand %p2758_p3, %p2755_p1 }
  0x75   : > { %2763 = shalt.err (!%p2760_p2)
}
  0x76   : > { %s2764_s29 = scalar_lea.vmem %s257_s15, 1024  ;;  %p2772_p4 = scmp.lt.s32.totalorder %s257_s15, %s257_s15 }
  0x77   : > { %p2765_p5 = scmp.ne.s32.totalorder %s257_s15, %s2764_s29  ;;  %p2773_p10 = scmp.lt.s32.totalorder %s2764_s29, %s2764_s29 }
  0x79   : > { %p2767_p7 = pnand %p2765_p5, %p3034_p8  ;;  %p2774_p11 = por %p2773_p10, %p2772_p4 }
  0x7b   : > { %p2768_p9 = pneg %p2767_p7 }
  0x7d   : > { %p2775_p12 = pnand %p2774_p11, %p2768_p9 }
  0x7f   : > { %2778 = shalt.err (!%p2775_p12)
}
  0x80   : > { %2534 = dma.hbm_to_vmem [thread:$0]  (!%p3018_p6), %s3614_s4, 1024, %s257_s15, [#allocation9], %s3620_s23, %s3620_s23, %s3621_s28  }
  0x81   : > { %s2924_s22 = smov [#allocation13]   ;;  %s2779_s17 = scalar_lea.hbm %s3616_s6, 16 }
  0x82   : > { %s283_s9 = sshll.u32 %s2924_s22, 4  ;;  %p2780_p13 = scmp.ne.s32.totalorder %s3616_s6, %s2779_s17  ;;  %s284_s9 = int_to_ptr.vmem [resolvable:$true] %s283_s9 }
  0x83   : > { %p2786_p3 = scmp.lt.u32.totalorder %s2779_s17, %s3616_s6 }
  0x84   : > { %p2782_p0 = pnand %p2780_p13, %p3034_p8 }
  0x86   : > { %p2783_p1 = pneg %p2782_p0 }
  0x88   : > { %p2788_p2 = pnand %p2786_p3, %p2783_p1 }
  0x8a   : > { %2791 = shalt.err (!%p2788_p2)
}
  0x8b   : > { %s2792_s15 = scalar_lea.vmem %s284_s9, 16  ;;  %s2799_s29 = scalar_lea.vmem %s284_s9, 32 }
  0x8c   : > { %p2793_p5 = scmp.ne.s32.totalorder %s284_s9, %s2792_s15  ;;  %p2800_p4 = scmp.lt.s32.totalorder %s284_s9, %s284_s9 }
  0x8d   : > { %p2801_p10 = scmp.lt.s32.totalorder %s2799_s29, %s2792_s15 }
  0x8e   : > { %p2795_p7 = pnand %p2793_p5, %p3034_p8 }
  0x8f   : > { %p2802_p11 = por %p2801_p10, %p2800_p4 }
  0x90   : > { %p2796_p9 = pneg %p2795_p7 }
  0x92   : > { %p2803_p12 = pnand %p2802_p11, %p2796_p9 }
  0x94   : > { %2806 = shalt.err (!%p2803_p12)
}
  0x95   : > { %2540 = dma.hbm_to_vmem [thread:$0]  (!%p3018_p6), %s3616_s6, 16, %s284_s9, [#allocation12]  }
  0x96   : > { %s2044_s19 = sadd.s32 4294967294, %s2915_s27   ;;  %s3167_s11 = sadd.s32 1, %s2915_s27  }
  0x97   : > { %s30_s22 = ssub.s32 %s2915_s27, %s3167_s11  ;;  %s33_s14 = sadd.s32 1, %s2911_s26 }
  0x98   : > { %p31_p8 = scmp.eq.s32.totalorder %s30_s22, 0  ;;  %p40_p13 = scmp.ne.s32.totalorder %s2911_s26, %s2907_s25 }
  0x99   : > { %p41_p0 = scmp.eq.s32.totalorder %s2915_s27, 0  ;;  %p46_p1 = scmp.ne.s32.totalorder %s2907_s25, %s2903_s24 }
  0x9a   : > { %s3178_s16 = scalar_select %p31_p8, %s2911_s26, %s33_s14  }
  0x9b   : > { %p42_p3 = por %p41_p0, %p40_p13  ;;  %p3628_p2 = scmp.eq.s32.totalorder %s3002_s30, 0 }
  0x9c   : > { %p196_p6 = scmp.eq.s32.totalorder %s3002_s30, 1  ;;  %p202_p7 = scmp.eq.s32.totalorder %s2044_s19, 1 }
  0x9d   : > { %p3182_p5 = por %p3628_p2, %p46_p1  ;;  %p2555_p9 = scmp.lt.s32.totalorder %s2915_s27, 2 }
  0x9e   : > { %s294_s9 = sand.u32 1, %s2911_s26   ;;  %p3189_p4 = por %p196_p6, %p40_p13 }
  0x9f   : > { %p3193_p10 = por %p202_p7, %p46_p1  ;;  %s2492_s21 = smul.u32 136, %s294_s9 }
  0xa0   : > { %s3630_s18 = scalar_select %p3189_p4, 1, 0 }
  0xa1   : > { %s3631_s20 = scalar_select %p3193_p10, 1, 0 }
  0xa2   : > { %s2129_s10 = smul.u32 2176, %s2915_s27  ;;  %p3198_p11 = pnand %p2555_p9, %p42_p3 }
  0xa3   : > { %s298_s19 = scalar_lea.vmem [#allocation2], %s2492_s21  ;;  %s3209_s14 = scalar_lea.sflag [#allocation3], %s294_s9 }
  0xa4   : > { %s3205_s13 = scalar_lea.hbm %s3610_s0, %s2129_s10  ;;  %s305_s22 = sshll.u32 %s298_s19, 4  ;;  %s3207_s22 = int_to_ptr.vmem [resolvable:$true] %s305_s22 }
  0xa5   : > { %s2807_s23 = scalar_lea.hbm %s3205_s13, 2176  ;;  %p2809_p8 = pneg %p3198_p11 }
  0xa6   : > { %p2808_p12 = scmp.ne.s32.totalorder %s3205_s13, %s2807_s23  ;;  %s2812_s12 = scalar_lea.hbm %s3610_s0, 4352 }
  0xa7   : > { %p2813_p1 = scmp.lt.u32.totalorder %s3205_s13, %s3610_s0  ;;  %p2814_p3 = scmp.lt.u32.totalorder %s2812_s12, %s2807_s23 }
  0xa8   : > { %p2810_p13 = pnand %p2809_p8, %p2808_p12  ;;  %p2816_p6 = scmp.lt.u32.totalorder %s2807_s23, %s3205_s13 }
  0xa9   : > { %p2815_p2 = por %p2814_p3, %p2813_p1 }
  0xaa   : > { %p2811_p0 = pneg %p2810_p13 }
  0xab   : > { %p2817_p7 = por %p2816_p6, %p2815_p2 }
  0xad   : > { %p2818_p9 = pnand %p2817_p7, %p2811_p0 }
  0xaf   : > { %2821 = shalt.err (!%p2818_p9)
}
  0xb0   : > { %s2822_s9 = scalar_lea.vmem %s3207_s22, 2176  ;;  %s2925_s21 = smov [#allocation2]  }
  0xb1   : > { %p2823_p12 = scmp.ne.s32.totalorder %s3207_s22, %s2822_s9  ;;  %s2827_s19 = sshll.u32 %s2925_s21, 4  ;;  %s2828_s19 = int_to_ptr.vmem [resolvable:$false] %s2827_s19 }
  0xb2   : > { %s2829_s1 = scalar_lea.vmem %s2828_s19, 4352  ;;  %p2830_p4 = scmp.lt.s32.totalorder %s3207_s22, %s2828_s19 }
  0xb3   : > { %p2825_p13 = pnand %p2823_p12, %p2809_p8  ;;  %p2831_p1 = scmp.lt.s32.totalorder %s2829_s1, %s2822_s9 }
  0xb5   : > { %p2826_p10 = pneg %p2825_p13  ;;  %p2832_p3 = por %p2831_p1, %p2830_p4 }
  0xb7   : > { %p2833_p2 = pnand %p2832_p3, %p2826_p10 }
  0xb9   : > { %2836 = shalt.err (!%p2833_p2)
}
  0xba   : > { %s3633_s23 = smov 8   ;;  %s3634_s28 = smov 128  }
  0xbb   : > { %2544 = dma.hbm_to_vmem [thread:$0]  (!%p3198_p11), %s3205_s13, 2176, %s3207_s22, %s3209_s14, %s3634_s28, %s3634_s28, %s3633_s23  }
  0xbc   : > { %p3635_p8 = scmp.ne.s32.totalorder %s3624_s8, 0 }
  0xbd   : > { %s3243_s10 = sand.u32 (!%p3635_p8), 1, %s2907_s25  }
  0xbe   : > { %317 = sbr.rel (%p3635_p8) target bundleno = 2061 (0x80d), region = 48  ;;  %s320_s12 = scalar_lea.sflag (!%p3635_p8), [#allocation3], %s3243_s10 }
  0xbf   : > { %s2493_s29 = smul.u32 (!%p3635_p8), 136, %s3243_s10 }
  0xc1   : > { %s3247_s9 = scalar_lea.vmem (!%p3635_p8), [#allocation2], %s2493_s29 }
  0xc5   : > { %2882 = dma.done.wait (%p3182_p5), %s320_s12, 2176  }
  0xc6   : > { %2884 = vsyncadd (%p3182_p5), %s320_s12, 4294965120  ;;  %p3636_p4 = scmp.eq.s32.totalorder %s3002_s30, 0 }
  0xc8   : > { %2886 = dma.done.wait (%p3636_p4), [#allocation6], 960   ;;  %p3637_p10 = pmov %p3636_p4 }
  0xc9   : > { %p3638_p11 = pmov %p3636_p4 }
  0xca   : > { %2888 = vsyncadd (%p3637_p10), [#allocation6], 4294966336 }
  0xcb   : > { %2890 = dma.done.wait (%p3638_p11), [#allocation9], 1040   ;;  %p3639_p0 = pmov %p3636_p4 }
  0xcd   : > { %2892 = vsyncadd (%p3639_p0), [#allocation9], 4294966256  ;;  %p3640_p6 = pmov %p3639_p0 }
  0xce   : > { %p3641_p7 = pmov %p3639_p0 }
  0xcf   : > { %2894 = dma.done.wait (%p3640_p6), [#allocation12], 1040  }
  0xd0   : > { %2896 = vsyncadd (%p3641_p7), [#allocation12], 4294966256  ;;  %v2926_v0 = vmov 0   ;;  %v2927_v1 = vmov 0.0|0.0   ;;  %v383_v2 = vld [vmem:[%s3247_s9 + $0x10] sm:$0xff]  ;;  %v381_v3 = vld [vmem:[%s3247_s9] sm:$0xff]  ;;  %v379_v30 = vlaneseq }
  0xd1   : > { %2618 = vset.pattern.permute.xlu1 %v2926_v0  ;;  %2617 = vset.pattern.permute.xlu0 %v2926_v0  ;;  %v384_v4 = vld [vmem:[%s3247_s9 + $0x18] sm:$0xff]  ;;  %v382_v5 = vld [vmem:[%s3247_s9 + $0x8] sm:$0xff]  ;;  %vm2928_vm0 = vmmov 0   ;;  %v2929_v6 = vmov 0.0   ;;  %v385_v9 = vld [vmem:[%s3247_s9 + $0x20] sm:$0xff]  ;;  %vm559_vm1 = vcmask 1041408  }
  0xd2   : > { %2403 = vmatprep.subr.bf16.mxu0 %v2927_v1  ;;  %2412 = vmatprep.subr.bf16.mxu1 %v2927_v1  ;;  %v500_v7 = vld [vmem:[#allocation5] sm:$0xff]  ;;  %v501_v10 = vld [vmem:[#allocation5 + $0x8] sm:$0xff]  ;;  %v502_v12 = vld [vmem:[#allocation5 + $0x10] sm:$0xff]  ;;  %v3293_v31 = vand.u32 127, %v379_v30  ;;  %vm507_vm2 = vcmask 408576   ;;  %s2932_s8 = smov 120  }
  0xd3   : > { %405 = vperm.xlu1 %2618, %v383_v2   ;;  %399 = vperm.xlu0 %2617, %v381_v3   ;;  %v386_v8 = vld [vmem:[%s3247_s9 + $0x28] sm:$0xff]  ;;  %v2404_v11 = vpack.c.bf16 %v501_v10, %v500_v7  ;;  %v388_v14 = vld [vmem:[%s3247_s9 + $0x38] sm:$0xff]  ;;  %v387_v15 = vld [vmem:[%s3247_s9 + $0x30] sm:$0xff]  ;;  %s2933_s17 = smov 112   ;;  %s2934_s15 = smov 104  }
  0xd4   : > { %2226 = vmatprep.mubr.msk.f32.mxu0 %vm2928_vm0, %v2929_v6  ;;  %2285 = vmatprep.mubr.msk.f32.mxu1 %vm2928_vm0, %v2929_v6  ;;  %v503_v13 = vld [vmem:[#allocation5 + $0x18] sm:$0xff]  ;;  %v504_v17 = vld [vmem:[#allocation5 + $0x20] sm:$0xff]  ;;  %v505_v18 = vld [vmem:[#allocation5 + $0x28] sm:$0xff]  ;;  %s2937_s13 = smov 8   ;;  %s2938_s22 = smov 16  }
  0xd5   : > { %2405 = vmatpush3.bf16.msra.mxu0 %v2404_v11  ;;  %v2407_v16 = vpack.c.bf16 %v503_v13, %v502_v12  ;;  %v390_v19 = vld [vmem:[%s3247_s9 + $0x48] sm:$0xff]  ;;  %v389_v20 = vld [vmem:[%s3247_s9 + $0x40] sm:$0xff]  ;;  %v2410_v21 = vpack.c.bf16 %v505_v18, %v504_v17  ;;  %v392_v22 = vld [vmem:[%s3247_s9 + $0x58] sm:$0xff]  ;;  %s2939_s14 = smov 24   ;;  %s2061_s21 = sshll.u32 %s3243_s10, 1 }
  0xd6   : > { %2406 = vmatprep.subr.bf16.mxu0 %v2927_v1  ;;  %v391_v23 = vld [vmem:[%s3247_s9 + $0x50] sm:$0xff]  ;;  %v506_v24 = vld [vmem:[#allocation5 + $0x30] sm:$0x3]  ;;  %v394_v25 = vld [vmem:[%s3247_s9 + $0x68] sm:$0xff]  ;;  %s2126_s19 = sshll.u32 %s3002_s30, 5  ;;  %s377_s1 = scalar_lea.vmem [#allocation14], %s2061_s21 }
  0xd7   : > { %408 = vperm.xlu1 %2618, %v384_v4   ;;  %402 = vperm.xlu0 %2617, %v382_v5   ;;  %v393_v26 = vld [vmem:[%s3247_s9 + $0x60] sm:$0xff]  ;;  %v396_v27 = vld [vmem:[%s3247_s9 + $0x78] sm:$0xff]  ;;  %v395_v28 = vld [vmem:[%s3247_s9 + $0x70] sm:$0xff]  ;;  %s1917_s23 = sshll.u32 %s377_s1, 4  ;;  %s3566_s12 = scalar_lea.hbm %s3617_s7, %s2126_s19  ;;  %s3568_s23 = int_to_ptr.vmem [resolvable:$true] %s1917_s23 }
  0xd8   : > { %v397_v29 = vld [vmem:[%s3247_s9 + $0x80] sm:$0xff]  ;;  %s1904_s9 = scalar_lea.sflag [#allocation4], %s3243_s10  ;;  %p3644_p9 = scmp.ne.s32.totalorder %s3630_s18, 0 }
  0xd9   : > { %2408 = vmatpush3.bf16.msra.mxu0 %v2407_v16  ;;  %s2940_s30 = smov [#allocation14]  }
  0xda   : > { %2409 = vmatprep.subr.bf16.mxu0 %v2927_v1 }
  0xdb   : > { %414 = vperm.xlu1 %2618, %v386_v8   ;;  %411 = vperm.xlu0 %2617, %v385_v9   ;;  %v2930_v8 = vmov 1966171168  }
  0xdc   : > { %v715_v9 = vunpack.c.l.s4 %v2930_v8 }
  0xdd   : > { %2411 = vmatpush3.bf16.msra.mxu0 %v2410_v21 }
  0xde   : > { %2224 = vmatprep.subr.mxu0 %v2929_v6 }
  0xdf   : > { %420 = vperm.xlu1 %2618, %v388_v14   ;;  %417 = vperm.xlu0 %2617, %v387_v15   ;;  %v716_v14 = vunpack.c.0.s8 %v715_v9  ;;  %v3394_v15 = vshrl.u32 %v379_v30, 7 }
  0xe1   : > { %2225 = vmatpush3.msk.msra.mxu0 %vm559_vm1, %v506_v24  ;;  %v719_v18 = vsub.s32 %v716_v14, %v3394_v15 }
  0xe2   : > { %2456 = vmatprep.subr.bf16.mxu0 %v2927_v1 }
  0xe3   : > { %426 = vperm.xlu1 %2618, %v390_v19   ;;  %423 = vperm.xlu0 %2617, %v389_v20  }
  0xe7   : > { %432 = vperm.xlu1 %2618, %v392_v22   ;;  %429 = vperm.xlu0 %2617, %v391_v23  }
  0xeb   : > { %438 = vperm.xlu1 %2618, %v394_v25   ;;  %435 = vperm.xlu0 %2617, %v393_v26  }
  0xef   : > { %444 = vperm.xlu1 %2618, %v396_v27   ;;  %441 = vperm.xlu0 %2617, %v395_v28  }
  0xf3   : > { %447 = vperm.xlu0 %2617, %v397_v29  }
 0x152   : > { %v400_v32 = vpop.permute.xlu0 %399  ;;  %v406_v34 = vpop.permute.xlu1 %405 }
 0x153   : > { %vm449_vm3 = vcmp.eq.s32.totalorder %v400_v32, %v3293_v31  ;;  %vm451_vm4 = vcmp.eq.s32.totalorder %v406_v34, %v3293_v31 }
 0x154   : > { %v2062_v33 = vsel %vm449_vm3, 1.0, %v2929_v6  ;;  %v2064_v37 = vsel %vm451_vm4, 1.0, %v2929_v6 }
 0x155   : > { %2227 = vmatmul.mubr.msk.f32.vlgmr.msra.gmra.mrb[0].mxu0 %vm507_vm2, %v2062_v33 }
 0x156   : > { %v403_v35 = vpop.permute.xlu0 %402  ;;  %2229 = vmatprep.mubr.msk.f32.mxu0 %vm2928_vm0, %v2929_v6  ;;  %v409_v38 = vpop.permute.xlu1 %408 }
 0x157   : > { %vm450_vm5 = vcmp.eq.s32.totalorder %v403_v35, %v3293_v31  ;;  %vm452_vm6 = vcmp.eq.s32.totalorder %v409_v38, %v3293_v31 }
 0x158   : > { %v2063_v36 = vsel %vm450_vm5, 1.0, %v2929_v6  ;;  %v2065_v40 = vsel %vm452_vm6, 1.0, %v2929_v6  ;;  %vm738_vm6 = vcmask 523264  }
 0x159   : > { %2230 = vmatmul.mubr.msk.f32.gmra.mrb[2].mxu0 %vm507_vm2, %v2063_v36 }
 0x15a   : > { %2232 = vmatprep.mubr.msk.f32.mxu0 %vm2928_vm0, %v2929_v6  ;;  %v412_v39 = vpop.permute.xlu0 %411  ;;  %v415_v41 = vpop.permute.xlu1 %414 }
 0x15b   : > { %vm453_vm7 = vcmp.eq.s32.totalorder %v412_v39, %v3293_v31  ;;  %vm454_vm8 = vcmp.eq.s32.totalorder %v415_v41, %v3293_v31 }
 0x15c   : > { %v2066_v42 = vsel %vm453_vm7, 1.0, %v2929_v6  ;;  %v2067_v44 = vsel %vm454_vm8, 1.0, %v2929_v6  ;;  %vm3384_vm7 = vmpackc.low %vm738_vm6, %vm738_vm6 }
 0x15d   : > { %2233 = vmatmul.mubr.msk.f32.gmra.mrb[4].mxu0 %vm507_vm2, %v2064_v37 }
 0x15e   : > { %2235 = vmatprep.mubr.msk.f32.mxu0 %vm2928_vm0, %v2929_v6  ;;  %v418_v43 = vpop.permute.xlu0 %417  ;;  %v421_v45 = vpop.permute.xlu1 %420 }
 0x15f   : > { %vm455_vm9 = vcmp.eq.s32.totalorder %v418_v43, %v3293_v31  ;;  %vm456_vm10 = vcmp.eq.s32.totalorder %v421_v45, %v3293_v31 }
 0x160   : > { %v2068_v46 = vsel %vm455_vm9, 1.0, %v2929_v6  ;;  %v2069_v48 = vsel %vm456_vm10, 1.0, %v2929_v6  ;;  %vm1127_vm9 = vcmask 1041409  }
 0x161   : > { %2236 = vmatmul.mubr.msk.f32.gmra.mrb[6].mxu0 %vm507_vm2, %v2065_v40 }
 0x162   : > { %2238 = vmatprep.mubr.msk.f32.mxu0 %vm2928_vm0, %v2929_v6  ;;  %v424_v47 = vpop.permute.xlu0 %423  ;;  %v427_v49 = vpop.permute.xlu1 %426 }
 0x163   : > { %vm457_vm11 = vcmp.eq.s32.totalorder %v424_v47, %v3293_v31  ;;  %vm458_vm12 = vcmp.eq.s32.totalorder %v427_v49, %v3293_v31 }
 0x164   : > { %v2070_v50 = vsel %vm457_vm11, 1.0, %v2929_v6  ;;  %v2071_v52 = vsel %vm458_vm12, 1.0, %v2929_v6  ;;  %vm1130_vm11 = vcmask 1042434  }
 0x165   : > { %2239 = vmatmul.mubr.msk.f32.gmra.mrb[8].mxu0 %vm507_vm2, %v2066_v42 }
 0x166   : > { %2241 = vmatprep.mubr.msk.f32.mxu0 %vm2928_vm0, %v2929_v6  ;;  %v430_v51 = vpop.permute.xlu0 %429  ;;  %v433_v53 = vpop.permute.xlu1 %432 }
 0x167   : > { %vm459_vm13 = vcmp.eq.s32.totalorder %v430_v51, %v3293_v31  ;;  %vm460_vm14 = vcmp.eq.s32.totalorder %v433_v53, %v3293_v31 }
 0x168   : > { %v2072_v54 = vsel %vm459_vm13, 1.0, %v2929_v6  ;;  %v2073_v56 = vsel %vm460_vm14, 1.0, %v2929_v6  ;;  %vm1133_vm13 = vcmask 1043459   ;;  %vm1191_vm14 = vcmask 60416  }
 0x169   : > { %2242 = vmatmul.mubr.msk.f32.gmra.mrb[10].mxu0 %vm507_vm2, %v2067_v44 }
 0x16a   : > { %2244 = vmatprep.mubr.msk.f32.mxu0 %vm2928_vm0, %v2929_v6  ;;  %v436_v55 = vpop.permute.xlu0 %435  ;;  %v439_v57 = vpop.permute.xlu1 %438 }
 0x16b   : > { %vm461_vm15 = vcmp.eq.s32.totalorder %v436_v55, %v3293_v31  ;;  %vm462_vm1 = vcmp.eq.s32.totalorder %v439_v57, %v3293_v31 }
 0x16c   : > { %v2074_v58 = vsel %vm461_vm15, 1.0, %v2929_v6  ;;  %v2075_v60 = vsel %vm462_vm1, 1.0, %v2929_v6  ;;  %vm1385_vm15 = vcmask 64512   ;;  %vm1390_vm1 = vcmask 130048  }
 0x16d   : > { %2245 = vmatmul.mubr.msk.f32.gmra.mrb[12].mxu0 %vm507_vm2, %v2068_v46 }
 0x16e   : > { %2247 = vmatprep.mubr.msk.f32.mxu0 %vm2928_vm0, %v2929_v6  ;;  %v442_v59 = vpop.permute.xlu0 %441  ;;  %v445_v61 = vpop.permute.xlu1 %444 }
 0x16f   : > { %vm463_vm3 = vcmp.eq.s32.totalorder %v442_v59, %v3293_v31  ;;  %vm464_vm4 = vcmp.eq.s32.totalorder %v445_v61, %v3293_v31 }
 0x170   : > { %v2076_v62 = vsel %vm463_vm3, 1.0, %v2929_v6  ;;  %v2077_v0 = vsel %vm464_vm4, 1.0, %v2929_v6  ;;  %vm1395_vm3 = vcmask 195584   ;;  %vm1400_vm4 = vcmask 261120  }
 0x171   : > { %2248 = vmatmul.mubr.msk.f32.gmra.mrb[14].mxu0 %vm507_vm2, %v2069_v48 }
 0x172   : > { %2250 = vmatprep.mubr.msk.f32.mxu0 %vm2928_vm0, %v2929_v6  ;;  %v448_v63 = vpop.permute.xlu0 %447 }
 0x173   : > { %vm465_vm5 = vcmp.eq.s32.totalorder %v448_v63, %v3293_v31 }
 0x174   : > { %v2078_v2 = vsel %vm465_vm5, 1.0, %v2929_v6  ;;  %vm1875_vm5 = vcmask 254976  }
 0x175   : > { %2251 = vmatmul.mubr.msk.f32.gmra.mrb[16].mxu0 %vm507_vm2, %v2070_v50 }
 0x176   : > { %2253 = vmatprep.mubr.msk.f32.mxu0 %vm2928_vm0, %v2929_v6 }
 0x179   : > { %2254 = vmatmul.mubr.msk.f32.gmra.mrb[18].mxu0 %vm507_vm2, %v2071_v52 }
 0x17a   : > { %2256 = vmatprep.mubr.msk.f32.mxu0 %vm2928_vm0, %v2929_v6 }
 0x17d   : > { %2257 = vmatmul.mubr.msk.f32.gmra.mrb[20].mxu0 %vm507_vm2, %v2072_v54 }
 0x17e   : > { %2259 = vmatprep.mubr.msk.f32.mxu0 %vm2928_vm0, %v2929_v6 }
 0x181   : > { %2260 = vmatmul.mubr.msk.f32.gmra.mrb[22].mxu0 %vm507_vm2, %v2073_v56 }
 0x182   : > { %2262 = vmatprep.mubr.msk.f32.mxu0 %vm2928_vm0, %v2929_v6 }
 0x185   : > { %2263 = vmatmul.mubr.msk.f32.gmra.mrb[24].mxu0 %vm507_vm2, %v2074_v58 }
 0x186   : > { %2265 = vmatprep.mubr.msk.f32.mxu0 %vm2928_vm0, %v2929_v6 }
 0x189   : > { %2266 = vmatmul.mubr.msk.f32.gmra.mrb[26].mxu0 %vm507_vm2, %v2075_v60  ;;  %v2931_v60 = vmov -9999.0  }
 0x18a   : > { %2268 = vmatprep.mubr.msk.f32.mxu0 %vm2928_vm0, %v2929_v6 }
 0x18d   : > { %2269 = vmatmul.mubr.msk.f32.gmra.mrb[28].mxu0 %vm507_vm2, %v2076_v62  ;;  %v2117_v62 = vld [vmem:[#allocation8] ss:$0 sm:$0xff] }
 0x18e   : > { %2271 = vmatprep.mubr.msk.f32.mxu0 %vm2928_vm0, %v2929_v6 }
 0x191   : > { %2272 = vmatmul.mubr.msk.f32.gmra.mrb[30].mxu0 %vm507_vm2, %v2077_v0 }
 0x192   : > { %2274 = vmatprep.mubr.msk.f32.mxu0 %vm2928_vm0, %v2929_v6 }
 0x195   : > { %2275 = vmatmul.mubr.msk.f32.gmra.mrb[32].mxu0 %vm507_vm2, %v2078_v2 }
 0x196   : > { %2351 = vmatprep.mubr.msk.f32.mxu0 %vm2928_vm0, %v2929_v6 }
 0x228   : > { %v3380_v3 = vpop.f32.mrb[0].mxu0 }
 0x229   : > { %v2228_v4 = vpop.f32.mrb[1].mxu0  ;;  %v720_v22 = vrot.slane %v3380_v3, %v719_v18 }
 0x22b   : > { %v728_v25 = vrot.slane %v720_v22, %v719_v18  ;;  %v721_v34 = vcombine.high %v720_v22, %v720_v22 }
 0x22c   : > { %v634_v5 = vpop.f32.mrb[2].mxu0 }
 0x22d   : > { %v2231_v7 = vpop.f32.mrb[3].mxu0  ;;  %v735_v37 = vrot.slane %v721_v34, %v719_v18  ;;  %v736_v48 = vcombine.high %v728_v25, %v728_v25 }
 0x22f   : > { %v737_v57 = vcombine.high %v735_v37, %v735_v37 }
 0x230   : > { %v639_v10 = vpop.f32.mrb[4].mxu0 }
 0x231   : > { %v3388_v12 = vpack.c.bf16 %v639_v10, %v634_v5  ;;  %v2234_v13 = vpop.f32.mrb[5].mxu0 }
 0x233   : > { %2415 = vmatpush3.bf16.xpose.msk.msra.mxu1 %vm3384_vm7, %v3388_v12 }
 0x234   : > { %v644_v16 = vpop.f32.mrb[6].mxu0  ;;  %2416 = vmatprep.subr.bf16.mxu1 %v2927_v1 }
 0x235   : > { %v2237_v17 = vpop.f32.mrb[7].mxu0 }
 0x238   : > { %v649_v19 = vpop.f32.mrb[8].mxu0 }
 0x239   : > { %v3398_v20 = vpack.c.bf16 %v649_v19, %v644_v16  ;;  %v2240_v21 = vpop.f32.mrb[9].mxu0 }
 0x23b   : > { %2419 = vmatpush3.bf16.xpose.msk.msra.mxu1 %vm3384_vm7, %v3398_v20 }
 0x23c   : > { %v654_v23 = vpop.f32.mrb[10].mxu0  ;;  %2420 = vmatprep.subr.bf16.mxu1 %v2927_v1 }
 0x23d   : > { %v2243_v24 = vpop.f32.mrb[11].mxu0 }
 0x240   : > { %v659_v26 = vpop.f32.mrb[12].mxu0 }
 0x241   : > { %v3405_v27 = vpack.c.bf16 %v659_v26, %v654_v23  ;;  %v2246_v28 = vpop.f32.mrb[13].mxu0 }
 0x242   : > { %2286 = vmatmul.mubr.msk.f32.vlgmr.msra.gmra.mrb[0].mxu1 %vm738_vm6, %v728_v25 }
 0x243   : > { %2423 = vmatpush3.bf16.xpose.msk.msra.mxu1 %vm3384_vm7, %v3405_v27  ;;  %2296 = vmatprep.mubr.msk.f32.mxu1 %vm2928_vm0, %v2929_v6 }
 0x244   : > { %v664_v29 = vpop.f32.mrb[14].mxu0  ;;  %2424 = vmatprep.subr.bf16.mxu1 %v2927_v1 }
 0x245   : > { %v2249_v30 = vpop.f32.mrb[15].mxu0 }
 0x248   : > { %v669_v31 = vpop.f32.mrb[16].mxu0 }
 0x249   : > { %v3414_v32 = vpack.c.bf16 %v669_v31, %v664_v29  ;;  %v2252_v33 = vpop.f32.mrb[17].mxu0 }
 0x24b   : > { %2427 = vmatpush3.bf16.xpose.msk.msra.mxu1 %vm3384_vm7, %v3414_v32 }
 0x24c   : > { %v674_v35 = vpop.f32.mrb[18].mxu0  ;;  %2428 = vmatprep.subr.bf16.mxu1 %v2927_v1 }
 0x24d   : > { %v2255_v36 = vpop.f32.mrb[19].mxu0 }
 0x250   : > { %v679_v38 = vpop.f32.mrb[20].mxu0 }
 0x251   : > { %v2429_v39 = vpack.c.bf16 %v679_v38, %v674_v35  ;;  %v2258_v40 = vpop.f32.mrb[21].mxu0  ;;  %v2935_v38 = vmov 1983009808  }
 0x252   : > { %2297 = vmatmul.mubr.msk.f32.vlgmr.msra.gmra.mrb[2].mxu1 %vm738_vm6, %v735_v37 }
 0x253   : > { %2431 = vmatpush3.bf16.xpose.msk.msra.mxu1 %vm3384_vm7, %v2429_v39  ;;  %2458 = vmatpush3.bf16.msra.mxu0 %v2429_v39  ;;  %v1159_v39 = vunpack.c.l.s4 %v2935_v38 }
 0x254   : > { %v684_v41 = vpop.f32.mrb[22].mxu0  ;;  %2432 = vmatprep.subr.bf16.mxu1 %v2927_v1  ;;  %2459 = vmatprep.subr.bf16.mxu0 %v2927_v1 }
 0x255   : > { %v2261_v42 = vpop.f32.mrb[23].mxu0  ;;  %2307 = vmatprep.mubr.msk.f32.mxu1 %vm2928_vm0, %v2929_v6 }
 0x258   : > { %v689_v43 = vpop.f32.mrb[24].mxu0 }
 0x259   : > { %v2433_v44 = vpack.c.bf16 %v689_v43, %v684_v41  ;;  %v2264_v45 = vpop.f32.mrb[25].mxu0  ;;  %v2936_v41 = vmov 1934713408  }
 0x25a   : > { %v1176_v42 = vunpack.c.l.s4 %v2936_v41 }
 0x25b   : > { %2435 = vmatpush3.bf16.xpose.msk.msra.mxu1 %vm3384_vm7, %v2433_v44  ;;  %2461 = vmatpush3.bf16.msra.mxu0 %v2433_v44 }
 0x25c   : > { %v694_v46 = vpop.f32.mrb[26].mxu0  ;;  %2436 = vmatprep.subr.bf16.mxu1 %v2927_v1  ;;  %2468 = vmatprep.subr.bf16.mxu0 %v2927_v1 }
 0x25d   : > { %v2267_v47 = vpop.f32.mrb[27].mxu0 }
 0x260   : > { %v699_v49 = vpop.f32.mrb[28].mxu0 }
 0x261   : > { %v3431_v50 = vpack.c.bf16 %v699_v49, %v694_v46  ;;  %v2270_v51 = vpop.f32.mrb[29].mxu0  ;;  %v1160_v49 = vunpack.c.0.s8 %v1159_v39 }
 0x262   : > { %2308 = vmatmul.mubr.msk.f32.vlgmr.msra.gmra.mrb[4].mxu1 %vm738_vm6, %v736_v48 }
 0x263   : > { %2439 = vmatpush3.bf16.xpose.msk.msra.mxu1 %vm3384_vm7, %v3431_v50  ;;  %2318 = vmatprep.mubr.msk.f32.mxu1 %vm2928_vm0, %v2929_v6 }
 0x264   : > { %v704_v52 = vpop.f32.mrb[30].mxu0  ;;  %2440 = vmatprep.subr.bf16.mxu1 %v2927_v1 }
 0x265   : > { %v2273_v53 = vpop.f32.mrb[31].mxu0 }
 0x268   : > { %v709_v54 = vpop.f32.mrb[32].mxu0 }
 0x269   : > { %v3440_v55 = vpack.c.bf16 %v709_v54, %v704_v52  ;;  %v2276_v56 = vpop.f32.mrb[33].mxu0 }
 0x26b   : > { %2443 = vmatpush3.bf16.xpose.msk.msra.mxu1 %vm3384_vm7, %v3440_v55 }
 0x26c   : > { %2444 = vmatprep.subr.bf16.mxu1 %v2927_v1 }
 0x272   : > { %2319 = vmatmul.mubr.msk.f32.vlgmr.msra.gmra.mrb[6].mxu1 %vm738_vm6, %v737_v57 }
 0x273   : > { %2446 = vmatpush3.bf16.msra.mxu1 %v3388_v12  ;;  %2329 = vmatprep.mubr.msk.f32.mxu1 %vm2928_vm0, %v2929_v6 }
 0x274   : > { %2447 = vmatprep.subr.bf16.mxu1 %v2927_v1 }
 0x277   : > { %2449 = vmatpush3.bf16.msra.mxu1 %v3398_v20 }
 0x278   : > { %2450 = vmatprep.subr.bf16.mxu1 %v2927_v1 }
 0x315   : > { %v819_v58 = vpop.f32.mrb[0].mxu1 }
 0x316   : > { %vm1075_vm2 = vcmp.ne.f32.partialorder %v819_v58, 0.0  ;;  %v2287_v59 = vpop.f32.mrb[1].mxu1 }
 0x317   : > { %v1079_v61 = vsel %vm1075_vm2, 0.0, %v2931_v60  ;;  %v1177_v59 = vunpack.c.0.s8 %v1176_v42  ;;  %vm1901_vm2 = vcmask 1024  }
 0x318   : > { %v1083_v63 = vadd.f32 %v1079_v61, %v819_v58 }
 0x31a   : > { %v1094_v0 = vadd.f32 %v2117_v62, %v1083_v63 }
 0x31c   : > { %1102 = vrot.lane.b32.xlu1 %v1094_v0, %s2932_s8 }
 0x320   : > { %1110 = vrot.lane.b32.xlu1 %v1094_v0, %s2933_s17 }
 0x325   : > { %v903_v2 = vpop.f32.mrb[2].mxu1 }
 0x326   : > { %vm1076_vm8 = vcmp.ne.f32.partialorder %v903_v2, 0.0  ;;  %v2298_v4 = vpop.f32.mrb[3].mxu1 }
 0x327   : > { %v1080_v5 = vsel %vm1076_vm8, 0.0, %v2931_v60 }
 0x328   : > { %v1084_v7 = vadd.f32 %v1080_v5, %v903_v2 }
 0x32a   : > { %v1095_v8 = vadd.f32 %v2117_v62, %v1084_v7 }
 0x32c   : > { %v1126_v9 = vrot.slane %v1095_v8, 7  ;;  %1112 = vrot.lane.b32.xlu0 %v1095_v8, %s2933_s17  ;;  %1104 = vrot.lane.b32.xlu1 %v1095_v8, %s2932_s8 }
 0x32e   : > { %v1128_v10 = vsel %vm1127_vm9, %v1126_v9, %v1094_v0 }
 0x330   : > { %1120 = vrot.lane.b32.xlu1 %v1095_v8, %s2934_s15  ;;  %v3477_v8 = vsub.s32 %v1177_v59, %v3394_v15 }
 0x335   : > { %v987_v11 = vpop.f32.mrb[4].mxu1 }
 0x336   : > { %vm1077_vm10 = vcmp.ne.f32.partialorder %v987_v11, 0.0  ;;  %v2309_v12 = vpop.f32.mrb[5].mxu1 }
 0x337   : > { %v1081_v13 = vsel %vm1077_vm10, 0.0, %v2931_v60 }
 0x338   : > { %v1085_v14 = vadd.f32 %v1081_v13, %v987_v11 }
 0x33a   : > { %v1096_v16 = vadd.f32 %v2117_v62, %v1085_v14 }
 0x33c   : > { %v1129_v17 = vrot.slane %v1096_v16, 6  ;;  %1114 = vrot.lane.b32.xlu1 %v1096_v16, %s2933_s17  ;;  %1106 = vrot.lane.b32.xlu0 %v1096_v16, %s2932_s8 }
 0x33e   : > { %v1131_v18 = vsel %vm1130_vm11, %v1129_v17, %v1128_v10 }
 0x340   : > { %1118 = vrot.lane.b32.xlu1 %v1094_v0, %s2934_s15  ;;  %1122 = vrot.lane.b32.xlu0 %v1096_v16, %s2934_s15 }
 0x345   : > { %v1071_v19 = vpop.f32.mrb[6].mxu1 }
 0x346   : > { %vm1078_vm12 = vcmp.ne.f32.partialorder %v1071_v19, 0.0  ;;  %v2320_v20 = vpop.f32.mrb[7].mxu1 }
 0x347   : > { %v1082_v21 = vsel %vm1078_vm12, 0.0, %v2931_v60 }
 0x348   : > { %v1086_v22 = vadd.f32 %v1082_v21, %v1071_v19 }
 0x34a   : > { %v1097_v23 = vadd.f32 %v2117_v62, %v1086_v22  ;;  %v3470_v62 = vsub.s32 %v1160_v49, %v3394_v15 }
 0x34c   : > { %1108 = vrot.lane.b32.xlu0 %v1097_v23, %s2932_s8  ;;  %v1132_v24 = vrot.slane %v1097_v23, 5  ;;  %s2837_s8 = scalar_lea.vmem %s3568_s23, 32 }
 0x34d   : > { %p2838_p5 = scmp.ne.s32.totalorder %s3568_s23, %s2837_s8 }
 0x34e   : > { %v1134_v25 = vsel %vm1133_vm13, %v1132_v24, %v1131_v18 }
 0x34f   : > { %p2839_p12 = pnand %p2838_p5, %p3644_p9 }
 0x350   : > { %1116 = vrot.lane.b32.xlu0 %v1097_v23, %s2933_s17  ;;  %s2841_s17 = sshll.u32 %s2940_s30, 4  ;;  %s2842_s17 = int_to_ptr.vmem [resolvable:$false] %s2841_s17 }
 0x351   : > { %p2840_p13 = pneg %p2839_p12  ;;  %p2844_p1 = scmp.lt.s32.totalorder %s3568_s23, %s2842_s17 }
 0x354   : > { %1124 = vrot.lane.b32.xlu0 %v1097_v23, %s2934_s15  ;;  %s2843_s15 = scalar_lea.vmem %s2842_s17, 64 }
 0x355   : > { %p2845_p3 = scmp.lt.s32.totalorder %s2843_s15, %s2837_s8 }
 0x357   : > { %p2846_p2 = por %p2845_p3, %p2844_p1 }
 0x359   : > { %p2847_p8 = pnand %p2846_p2, %p2840_p13 }
 0x38e   : > { %v1103_v26 = vpop.permute.xlu1 %1102 }
 0x392   : > { %v1111_v28 = vpop.permute.xlu1 %1110 }
 0x39e   : > { %v1113_v29 = vpop.permute.xlu0 %1112  ;;  %v1105_v30 = vpop.permute.xlu1 %1104 }
 0x39f   : > { %v1141_v37 = vrot.slane %v1113_v29, 7  ;;  %v1135_v45 = vrot.slane %v1105_v30, 7 }
 0x3a1   : > { %v1142_v46 = vsel %vm1127_vm9, %v1141_v37, %v1111_v28  ;;  %v1136_v60 = vsel %vm1127_vm9, %v1135_v45, %v1103_v26 }
 0x3a2   : > { %v1121_v33 = vpop.permute.xlu1 %1120 }
 0x3a3   : > { %v1147_v47 = vrot.slane %v1121_v33, 7 }
 0x3ae   : > { %v1107_v31 = vpop.permute.xlu0 %1106  ;;  %v1115_v35 = vpop.permute.xlu1 %1114 }
 0x3af   : > { %v1143_v40 = vrot.slane %v1115_v35, 6  ;;  %v1137_v52 = vrot.slane %v1107_v31, 6 }
 0x3b1   : > { %v1144_v51 = vsel %vm1130_vm11, %v1143_v40, %v1142_v46  ;;  %v1138_v63 = vsel %vm1130_vm11, %v1137_v52, %v1136_v60 }
 0x3b2   : > { %v1123_v34 = vpop.permute.xlu0 %1122  ;;  %v1119_v43 = vpop.permute.xlu1 %1118 }
 0x3b3   : > { %v1149_v53 = vrot.slane %v1123_v34, 6  ;;  %v1148_v54 = vsel %vm1127_vm9, %v1147_v47, %v1119_v43 }
 0x3b5   : > { %v1150_v0 = vsel %vm1130_vm11, %v1149_v53, %v1148_v54 }
 0x3be   : > { %v1109_v36 = vpop.permute.xlu0 %1108 }
 0x3bf   : > { %v1139_v56 = vrot.slane %v1109_v36, 5 }
 0x3c1   : > { %v1140_v4 = vsel %vm1133_vm13, %v1139_v56, %v1138_v63 }
 0x3c2   : > { %v1117_v44 = vpop.permute.xlu0 %1116 }
 0x3c3   : > { %v1145_v48 = vrot.slane %v1117_v44, 5 }
 0x3c5   : > { %v1146_v57 = vsel %vm1133_vm13, %v1145_v48, %v1144_v51  ;;  %v1236_v48 = vld [vmem:[#allocation7] sm:$0xf] }
 0x3c6   : > { %v1125_v58 = vpop.permute.xlu0 %1124  ;;  %v1157_v2 = vcombine.low %v1134_v25, %v1146_v57 }
 0x3c7   : > { %v1151_v61 = vrot.slane %v1125_v58, 5 }
 0x3c8   : > { %v1164_v9 = vrot.slane %v1157_v2, %v3470_v62 }
 0x3c9   : > { %v1152_v5 = vsel %vm1133_vm13, %v1151_v61, %v1150_v0 }
 0x3ca   : > { %v1165_v7 = vcombine.low %v1140_v4, %v1152_v5 }
 0x3cc   : > { %v1172_v10 = vrot.slane %v1165_v7, %v3470_v62 }
 0x3ce   : > { %v1173_v11 = vcombine.low %v1164_v9, %v1172_v10  ;;  %v1174_v12 = vcombine.high %v1164_v9, %v1172_v10 }
 0x3d0   : > { %v1181_v13 = vrot.slane %v1173_v11, %v3477_v8  ;;  %v1188_v14 = vrot.slane %v1174_v12, %v3477_v8 }
 0x3d2   : > { %v1192_v16 = vsel %vm1191_vm14, %v1181_v13, -inf  ;;  %v1189_v17 = vcombine.high %v1181_v13, %v2929_v6  ;;  %v1190_v18 = vcombine.high %v1188_v14, %v2929_v6  ;;  %v1198_v20 = vsel %vm1191_vm14, %v1188_v14, -inf }
 0x3d3   : > { %1193 = vmax.xlane.f32.xlu1 %v1192_v16 }
 0x3d4   : > { %v1195_v15 = vsel %vm1191_vm14, %v1189_v17, -inf  ;;  %v1201_v19 = vsel %vm1191_vm14, %v1190_v18, -inf }
 0x3d5   : > { %1196 = vmax.xlane.f32.xlu0 %v1195_v15 }
 0x3d7   : > { %1202 = vmax.xlane.f32.xlu1 %v1201_v19 }
 0x3d9   : > { %1199 = vmax.xlane.f32.xlu0 %v1198_v20 }
 0x460   : > { %v1194_v21 = vpop.xlane.xlu1 %1193 }
 0x461   : > { %v1204_v22 = vsub.f32 %v1181_v13, %v1194_v21 }
 0x462   : > { %v1197_v23 = vpop.xlane.xlu0 %1196 }
 0x463   : > { %v1208_v24 = vmul.f32 1.442695, %v1204_v22  ;;  %v1205_v25 = vsub.f32 %v1189_v17, %v1197_v23 }
 0x464   : > { %v1203_v26 = vpop.xlane.xlu1 %1202 }
 0x465   : > { %2619 = vpow2.f32 %v1208_v24  ;;  %v1210_v28 = vmul.f32 1.442695, %v1205_v25  ;;  %v1207_v29 = vsub.f32 %v1190_v18, %v1203_v26 }
 0x466   : > { %v1200_v30 = vpop.xlane.xlu0 %1199 }
 0x467   : > { %2621 = vpow2.f32 %v1210_v28  ;;  %v1214_v31 = vmul.f32 1.442695, %v1207_v29  ;;  %v1206_v33 = vsub.f32 %v1188_v14, %v1200_v30 }
 0x469   : > { %2623 = vpow2.f32 %v1214_v31  ;;  %v1212_v34 = vmul.f32 1.442695, %v1206_v33 }
 0x46b   : > { %2625 = vpow2.f32 %v1212_v34 }
 0x46f   : > { %v2620_v35 = vpop.eup %2619 }
 0x470   : > { %v1216_v36 = vsel %vm1191_vm14, %v2620_v35, 0.0 }
 0x471   : > { %v2622_v37 = vpop.eup %2621  ;;  %1217 = vadd.xlane.f32.xlu0 %v1216_v36 }
 0x472   : > { %v1219_v38 = vsel %vm1191_vm14, %v2622_v37, 0.0 }
 0x473   : > { %v2624_v39 = vpop.eup %2623  ;;  %1220 = vadd.xlane.f32.xlu1 %v1219_v38 }
 0x474   : > { %v1225_v41 = vsel %vm1191_vm14, %v2624_v39, 0.0 }
 0x475   : > { %v2626_v40 = vpop.eup %2625 }
 0x476   : > { %v1222_v42 = vsel %vm1191_vm14, %v2626_v40, 0.0 }
 0x477   : > { %1226 = vadd.xlane.f32.xlu1 %v1225_v41  ;;  %1223 = vadd.xlane.f32.xlu0 %v1222_v42  ;;  %v1694_v42 = vld [vmem:[#allocation10 + $0x8] sm:$0xff] }
 0x4fe   : > { %v1218_v43 = vpop.xlane.xlu0 %1217 }
 0x4ff   : > { %2627 = vrcp.f32 %v1218_v43 }
 0x500   : > { %v1221_v44 = vpop.xlane.xlu1 %1220 }
 0x501   : > { %2629 = vrcp.f32 %v1221_v44 }
 0x504   : > { %v1227_v45 = vpop.xlane.xlu1 %1226  ;;  %v1224_v46 = vpop.xlane.xlu0 %1223 }
 0x505   : > { %2631 = vrcp.f32 %v1227_v45 }
 0x506   : > { %2633 = vrcp.f32 %v1224_v46 }
 0x509   : > { %v2628_v47 = vpop.eup %2627 }
 0x50a   : > { %v1229_v49 = vmul.f32 %v2628_v47, %v2620_v35 }
 0x50b   : > { %v2630_v51 = vpop.eup %2629 }
 0x50c   : > { %v1231_v52 = vmul.f32 %v2630_v51, %v2622_v37  ;;  %v1237_v53 = vmul.f32 %v1236_v48, %v1229_v49 }
 0x50e   : > { %v1244_v54 = vrot.slane %v1237_v53, %v3470_v62  ;;  %v1262_v56 = vmul.f32 %v1236_v48, %v1231_v52  ;;  %v1695_v52 = vld [vmem:[#allocation10 + $0x10] sm:$0xff]  ;;  %v1696_v53 = vld [vmem:[#allocation10 + $0x18] sm:$0xff] }
 0x50f   : > { %v2632_v57 = vpop.eup %2631 }
 0x510   : > { %v2634_v58 = vpop.eup %2633  ;;  %v1235_v59 = vmul.f32 %v2632_v57, %v2624_v39  ;;  %v1252_v60 = vrot.slane %v1244_v54, %v3477_v8  ;;  %v1245_v61 = vcombine.high %v1244_v54, %v2929_v6  ;;  %v1269_v63 = vrot.slane %v1262_v56, %v3470_v62  ;;  %v1697_v54 = vld [vmem:[#allocation10 + $0x20] sm:$0xff]  ;;  %v1698_v56 = vld [vmem:[#allocation10 + $0x28] sm:$0xff] }
 0x511   : > { %v1233_v0 = vmul.f32 %v2634_v58, %v2626_v40  ;;  %v2487_v57 = vpack.c.bf16 %v1698_v56, %v1697_v54  ;;  %v1699_v58 = vld [vmem:[#allocation10 + $0x30] sm:$0xff] }
 0x512   : > { %v1260_v2 = vcombine.high %v1252_v60, %v2929_v6  ;;  %v1259_v4 = vrot.slane %v1245_v61, %v3477_v8  ;;  %v1277_v5 = vrot.slane %v1269_v63, %v3477_v8  ;;  %v1312_v7 = vmul.f32 %v1236_v48, %v1235_v59  ;;  %v1700_v59 = vld [vmem:[#allocation10 + $0x38] sm:$0xff]  ;;  %v1701_v61 = vld [vmem:[#allocation11] sm:$0xff] }
 0x513   : > { %v1287_v9 = vmul.f32 %v1236_v48, %v1233_v0  ;;  %v1270_v16 = vcombine.high %v1269_v63, %v2929_v6  ;;  %v1703_v0 = vld [vmem:[#allocation11 + $0x10] sm:$0xff] }
 0x514   : > { %1341 = vrot.lane.b32.xlu0 %v1260_v2, %s2937_s13  ;;  %1357 = vrot.lane.b32.xlu1 %v1259_v4, %s2938_s22  ;;  %v1319_v10 = vrot.slane %v1312_v7, %v3470_v62  ;;  %v1285_v12 = vcombine.high %v1277_v5, %v2929_v6  ;;  %v1261_v13 = vcombine.high %v1259_v4, %v2929_v6  ;;  %v1704_v2 = vld [vmem:[#allocation11 + $0x18] sm:$0xff]  ;;  %v1706_v7 = vld [vmem:[#allocation11 + $0x28] sm:$0xff] }
 0x515   : > { %v1294_v11 = vrot.slane %v1287_v9, %v3470_v62  ;;  %v1284_v19 = vrot.slane %v1270_v16, %v3477_v8  ;;  %v2472_v4 = vpack.c.bf16 %v1704_v2, %v1703_v0 }
 0x516   : > { %v1327_v14 = vrot.slane %v1319_v10, %v3477_v8  ;;  %v1320_v20 = vcombine.high %v1319_v10, %v2929_v6  ;;  %v1707_v10 = vld [vmem:[#allocation11 + $0x30] sm:$0xff] }
 0x517   : > { %v1302_v17 = vrot.slane %v1294_v11, %v3477_v8  ;;  %v1286_v62 = vcombine.high %v1284_v19, %v2929_v6  ;;  %v1295_v21 = vcombine.high %v1294_v11, %v2929_v6 }
 0x518   : > { %1343 = vrot.lane.b32.xlu0 %v1285_v12, %s2937_s13  ;;  %1373 = vrot.lane.b32.xlu1 %v1261_v13, %s2939_s14  ;;  %v1335_v18 = vcombine.high %v1327_v14, %v2929_v6  ;;  %v1334_v22 = vrot.slane %v1320_v20, %v3477_v8 }
 0x519   : > { %v1310_v15 = vcombine.high %v1302_v17, %v2929_v6  ;;  %v1309_v23 = vrot.slane %v1295_v21, %v3477_v8 }
 0x51a   : > { %v1336_v24 = vcombine.high %v1334_v22, %v2929_v6 }
 0x51b   : > { %v1311_v25 = vcombine.high %v1309_v23, %v2929_v6 }
 0x51c   : > { %1347 = vrot.lane.b32.xlu0 %v1335_v18, %s2937_s13  ;;  %1345 = vrot.lane.b32.xlu1 %v1310_v15, %s2937_s13 }
 0x520   : > { %1375 = vrot.lane.b32.xlu0 %v1286_v62, %s2939_s14  ;;  %1359 = vrot.lane.b32.xlu1 %v1284_v19, %s2938_s22 }
 0x524   : > { %1363 = vrot.lane.b32.xlu0 %v1334_v22, %s2938_s22  ;;  %1361 = vrot.lane.b32.xlu1 %v1309_v23, %s2938_s22 }
 0x528   : > { %1379 = vrot.lane.b32.xlu0 %v1336_v24, %s2939_s14  ;;  %1377 = vrot.lane.b32.xlu1 %v1311_v25, %s2939_s14 }
 0x586   : > { %v1358_v26 = vpop.permute.xlu1 %1357  ;;  %v1342_v28 = vpop.permute.xlu0 %1341 }
 0x587   : > { %v1386_v29 = vsel %vm1385_vm15, %v1252_v60, %v1342_v28  ;;  %v2490_v60 = vpack.c.bf16 %v1700_v59, %v1699_v58  ;;  %v2124_v28 = vld [vmem:[#allocation13] ss:$0 sm:$0xff] }
 0x588   : > { %v1391_v31 = vsel %vm1390_vm1, %v1386_v29, %v1358_v26 }
 0x58a   : > { %v1374_v30 = vpop.permute.xlu1 %1373  ;;  %v1344_v8 = vpop.permute.xlu0 %1343 }
 0x58b   : > { %v1396_v33 = vsel %vm1395_vm3, %v1391_v31, %v1374_v30  ;;  %v1387_v36 = vsel %vm1385_vm15, %v1277_v5, %v1344_v8  ;;  %v1705_v5 = vld [vmem:[#allocation11 + $0x20] sm:$0xff] }
 0x58c   : > { %2330 = vmatmul.mubr.msk.f32.vlgmr.msra.gmra.mrb[8].mxu1 %vm1400_vm4, %v1396_v33  ;;  %v2475_v9 = vpack.c.bf16 %v1706_v7, %v1705_v5 }
 0x58d   : > { %2452 = vmatpush3.bf16.msra.mxu1 %v3405_v27  ;;  %2340 = vmatprep.mubr.msk.f32.mxu1 %vm2928_vm0, %v2929_v6 }
 0x58e   : > { %v1346_v34 = vpop.permute.xlu1 %1345  ;;  %v1348_v35 = vpop.permute.xlu0 %1347  ;;  %2453 = vmatprep.subr.bf16.mxu1 %v2927_v1 }
 0x58f   : > { %v1388_v43 = vsel %vm1385_vm15, %v1302_v17, %v1346_v34  ;;  %v1389_v44 = vsel %vm1385_vm15, %v1327_v14, %v1348_v35 }
 0x591   : > { %2455 = vmatpush3.bf16.msra.mxu1 %v3414_v32  ;;  %v1693_v32 = vld [vmem:[#allocation10] sm:$0xff] }
 0x592   : > { %v1360_v37 = vpop.permute.xlu1 %1359  ;;  %v1376_v38 = vpop.permute.xlu0 %1375  ;;  %2462 = vmatprep.subr.bf16.mxu1 %v2927_v1  ;;  %v2481_v48 = vpack.c.bf16 %v1694_v42, %v1693_v32 }
 0x593   : > { %v1392_v39 = vsel %vm1390_vm1, %v1387_v36, %v1360_v37 }
 0x594   : > { %v1397_v40 = vsel %vm1395_vm3, %v1392_v39, %v1376_v38 }
 0x595   : > { %2341 = vmatmul.mubr.msk.f32.vlgmr.msra.gmra.mrb[10].mxu1 %vm1400_vm4, %v1397_v40 }
 0x596   : > { %2464 = vmatpush3.bf16.msra.mxu1 %v3431_v50  ;;  %v1362_v27 = vpop.permute.xlu1 %1361  ;;  %v1364_v41 = vpop.permute.xlu0 %1363  ;;  %2362 = vmatprep.mubr.msk.f32.mxu1 %vm2928_vm0, %v2929_v6 }
 0x597   : > { %2465 = vmatprep.subr.bf16.mxu1 %v2927_v1  ;;  %v1393_v45 = vsel %vm1390_vm1, %v1388_v43, %v1362_v27  ;;  %v1394_v46 = vsel %vm1390_vm1, %v1389_v44, %v1364_v41 }
 0x59a   : > { %2467 = vmatpush3.bf16.msra.mxu1 %v3440_v55  ;;  %v1378_v50 = vpop.permute.xlu1 %1377  ;;  %v1380_v47 = vpop.permute.xlu0 %1379  ;;  %v2484_v55 = vpack.c.bf16 %v1696_v53, %v1695_v52 }
 0x59b   : > { %v1398_v49 = vsel %vm1395_vm3, %v1393_v45, %v1378_v50  ;;  %v1399_v51 = vsel %vm1395_vm3, %v1394_v46, %v1380_v47  ;;  %2480 = vmatprep.subr.bf16.mxu1 %v2927_v1 }
 0x59c   : > { %2352 = vmatmul.mubr.msk.f32.vlgmr.msra.gmra.mrb[34].mxu0 %vm1400_vm4, %v1398_v49 }
 0x59d   : > { %2363 = vmatmul.mubr.msk.f32.vlgmr.msra.gmra.mrb[12].mxu1 %vm1400_vm4, %v1399_v51  ;;  %2381 = vmatprep.mubr.msk.f32.mxu0 %vm2928_vm0, %v2929_v6 }
 0x59e   : > { %2482 = vmatpush3.bf16.msra.mxu1 %v2481_v48  ;;  %2400 = vmatprep.mubr.msk.f32.mxu1 %vm2928_vm0, %v2929_v6  ;;  %v1702_v6 = vld [vmem:[#allocation11 + $0x8] sm:$0xff]  ;;  %vm1883_vm0 = vcmask 257026  }
 0x59f   : > { %2483 = vmatprep.subr.bf16.mxu1 %v2927_v1  ;;  %v2469_v63 = vpack.c.bf16 %v1702_v6, %v1701_v61 }
 0x5a1   : > { %2470 = vmatpush3.bf16.msra.mxu0 %v2469_v63 }
 0x5a2   : > { %2485 = vmatpush3.bf16.msra.mxu1 %v2484_v55  ;;  %2471 = vmatprep.subr.bf16.mxu0 %v2927_v1 }
 0x5a3   : > { %2486 = vmatprep.subr.bf16.mxu1 %v2927_v1 }
 0x5a5   : > { %2473 = vmatpush3.bf16.msra.mxu0 %v2472_v4 }
 0x5a6   : > { %2488 = vmatpush3.bf16.msra.mxu1 %v2487_v57  ;;  %2474 = vmatprep.subr.bf16.mxu0 %v2927_v1 }
 0x5a7   : > { %2489 = vmatprep.subr.bf16.mxu1 %v2927_v1 }
 0x5a9   : > { %2476 = vmatpush3.bf16.msra.mxu0 %v2475_v9 }
 0x5aa   : > { %2491 = vmatpush3.bf16.msra.mxu1 %v2490_v60  ;;  %2477 = vmatprep.subr.bf16.mxu0 %v2927_v1 }
 0x5ad   : > { %2401 = vmatmul.mubr.msk.f32.vlgmr.msra.gmra.mrb[14].mxu1 %vm738_vm6, %v3380_v3  ;;  %v1708_v3 = vld [vmem:[#allocation11 + $0x38] sm:$0xff] }
 0x5ae   : > { %v2478_v11 = vpack.c.bf16 %v1708_v3, %v1707_v10 }
 0x5b0   : > { %2479 = vmatpush3.bf16.msra.mxu0 %v2478_v11 }
 0x65f   : > { %v1470_v12 = vpop.f32.mrb[8].mxu1 }
 0x660   : > { %v2331_v13 = vpop.f32.mrb[9].mxu1 }
 0x668   : > { %v1543_v14 = vpop.f32.mrb[10].mxu1 }
 0x669   : > { %v1713_v16 = vrot.slane %v1543_v14, 7  ;;  %v2342_v17 = vpop.f32.mrb[11].mxu1 }
 0x66b   : > { %v1714_v18 = vsel %vm1127_vm9, %v1713_v16, %v1470_v12 }
 0x66f   : > { %v1616_v15 = vpop.f32.mrb[34].mxu0 }
 0x670   : > { %v1715_v19 = vrot.slane %v1616_v15, 6  ;;  %v1689_v62 = vpop.f32.mrb[12].mxu1  ;;  %v2353_v20 = vpop.f32.mrb[35].mxu0 }
 0x671   : > { %v1717_v21 = vrot.slane %v1689_v62, 5  ;;  %v2364_v22 = vpop.f32.mrb[13].mxu1 }
 0x672   : > { %v1716_v23 = vsel %vm1130_vm11, %v1715_v19, %v1714_v18 }
 0x673   : > { %v1718_v1 = vsel %vm1133_vm13, %v1717_v21, %v1716_v23 }
 0x674   : > { %2382 = vmatmul.mubr.msk.f32.vlgmr.msra.gmra.mrb[36].mxu0 %vm738_vm6, %v1718_v1 }
 0x680   : > { %v1859_v24 = vpop.f32.mrb[14].mxu1 }
 0x681   : > { %v2402_v25 = vpop.f32.mrb[15].mxu1 }
 0x747   : > { %v1787_v26 = vpop.f32.mrb[36].mxu0 }
 0x748   : > { %v1860_v29 = vadd.f32 %v1859_v24, %v1787_v26  ;;  %v2383_v30 = vpop.f32.mrb[37].mxu0 }
 0x74a   : > { %v1870_v31 = vadd.f32 %v2124_v28, %v1860_v29 }
 0x74c   : > { %v1879_v8 = vmul.f32 %v1870_v31, %v1870_v31  ;;  %v1872_v33 = vrot.slane %v1870_v31, 2 }
 0x74e   : > { %v1884_v34 = vsel %vm1883_vm0, %v1879_v8, 0.0  ;;  %v1880_v35 = vsel %vm1875_vm5, %v1879_v8, 0.0  ;;  %v1874_v36 = vmul.f32 %v1872_v33, %v1870_v31 }
 0x74f   : > { %1885 = vadd.xlane.f32.xlu1 %v1884_v34  ;;  %1881 = vadd.xlane.f32.xlu0 %v1880_v35 }
 0x750   : > { %v1876_v37 = vsel %vm1875_vm5, %v1874_v36, 0.0 }
 0x753   : > { %1877 = vadd.xlane.f32.xlu0 %v1876_v37 }
 0x7dc   : > { %v1886_v38 = vpop.xlane.xlu1 %1885  ;;  %v1882_v40 = vpop.xlane.xlu0 %1881 }
 0x7dd   : > { %v1888_v39 = vrot.slane %v1886_v38, 2 }
 0x7df   : > { %v1890_v27 = vmul.f32 %v1888_v39, %v1882_v40 }
 0x7e0   : > { %v1878_v50 = vpop.xlane.xlu0 %1877 }
 0x7e1   : > { %2635 = vrsqrt.f32 %v1890_v27  ;;  %vm1893_vm6 = vcmp.eq.f32.partialorder %v1890_v27, inf  ;;  %v1896_v42 = vand.u32 2147483648, %v1890_v27  ;;  %vm1895_vm7 = vcmp.eq.f32.partialorder %v1890_v27, 0.0 }
 0x7eb   : > { %v2636_v41 = vpop.eup %2635 }
 0x7ec   : > { %v1892_v32 = vmul.f32 %v2636_v41, %v1890_v27 }
 0x7ee   : > { %v1894_v43 = vsel %vm1893_vm6, %v1890_v27, %v1892_v32 }
 0x7ef   : > { %v1897_v44 = vsel %vm1895_vm7, %v1896_v42, %v1894_v43 }
 0x7f0   : > { %v1898_v45 = vmax.f32 %v1897_v44, 1e-08 }
 0x7f2   : > { %2637 = vrcp.f32 %v1898_v45 }
 0x7fc   : > { %v2638_v46 = vpop.eup %2637 }
 0x7fd   : > { %v1900_v47 = vmul.f32 %v2638_v46, %v1878_v50 }
 0x7ff   : > { %1902 = vst.msk [vmem:[%s377_s1] sm:$0x3] %vm1901_vm2, %v1900_v47 }
 0x800   : > { %2850 = shalt.err (!%p2847_p8)
}
 0x801   : > { %s2851_s10 = scalar_lea.hbm %s3566_s12, 32  ;;  %s2855_s14 = scalar_lea.hbm %s3617_s7, 64 }
 0x802   : > { %p2852_p4 = scmp.ne.s32.totalorder %s3566_s12, %s2851_s10  ;;  %p2856_p0 = scmp.lt.u32.totalorder %s3566_s12, %s3617_s7 }
 0x803   : > { %p2857_p6 = scmp.lt.u32.totalorder %s2855_s14, %s2851_s10  ;;  %p2859_p5 = scmp.lt.u32.totalorder %s2851_s10, %s3566_s12 }
 0x804   : > { %p2853_p10 = pnand %p2852_p4, %p3644_p9 }
 0x805   : > { %p2858_p7 = por %p2857_p6, %p2856_p0 }
 0x806   : > { %p2854_p11 = pneg %p2853_p10 }
 0x807   : > { %p2860_p12 = por %p2859_p5, %p2858_p7 }
 0x809   : > { %p2861_p13 = pnand %p2860_p12, %p2854_p11 }
 0x80b   : > { %2864 = shalt.err (!%p2861_p13)
}
 0x80c   : > { %2520 = dma.vmem_to_hbm [thread:$0]  (%p3644_p9), %s3568_s23, 32, %s3566_s12, %s1904_s9  }
 0x80d PF: > { %s1929_s1 = sand.u32 1, %s2903_s24   ;;  %p3645_p1 = scmp.ne.s32.totalorder %s3631_s20, 0 }
 0x80e   : > { %p3646_p3 = scmp.ge.s32.totalorder %s2915_s27, 2  ;;  %s1930_s28 = scalar_lea.sflag [#allocation4], %s1929_s1 }
 0x810   : > { %p2546_p2 = pnand %p3646_p3, %p3645_p1 }
 0x812   : > { %2898 = dma.done.wait (!%p2546_p2), %s1930_s28, 32  }
 0x813   : > { %2900 = vsyncadd (!%p2546_p2), %s1930_s28, 4294967264  ;;  %p23_p8 = scmp.ge.s32.totalorder %s3167_s11, 4   ;;  %s3647_s24 = smov %s2907_s25 }
 0x814   : > { %s3648_s25 = smov %s2911_s26  ;;  %s3649_s26 = smov %s3178_s16 }
 0x815   : > { %s3650_s27 = smov %s3167_s11  ;;  %25 = sbr.rel (!%p23_p8) target bundleno = 10 (0xa), region = 117 }
 0x81c   :  { %1935 = vsyncpa [#allocation3], 1 }
 0x81d   :  { %1937 = vsyncpa [#allocation3 + $0x1], 1 }
 0x81e   :  { %1938 = vsyncpa [#allocation6], 1 }
 0x81f   :  { %1939 = vsyncpa [#allocation9], 1 }
 0x820   :  { %1940 = vsyncpa [#allocation12], 1 }
 0x821   :  { %1941 = vsyncpa [#allocation4], 1 }
 0x822   :  { %1943 = vsyncpa [#allocation4 + $0x1], 1 }

</bundles_post_ra>
